<compile_context>
chip_gen: v7x
topology: tpu7x:2x2x1
jax: 0.10.0
libtpu: 0.0.40
codegen_flags: <defaults>
</compile_context>

<pallas_src>
import math

import jax
import jax.numpy as jnp
from jax.experimental import pallas as pl
from jax.experimental.pallas import tpu as pltpu

NUM_CAT = 7
NUM_CONT = 3
NUM_CLASSES = 2
CAT_VOCAB = 10
CAT_EMBED = 64
IMG_C, IMG_H, IMG_W = 3, 32, 32          # image input shape (dead branch, unused)
TABLE_OUT_DIM = 1024
TAB_IN_DIM = NUM_CAT * CAT_EMBED + NUM_CONT   # 451
TAB_IN_PAD = 512                              # lane-pad 451 -> 512
OUT_PAD = 128                                 # lane-dense output store
BIAS_PACK = 1024 + 512 + 256 + 128 + 128      # packed bias widths = 2048
MAX_TILE_B = 256                              # MXU-height tile on v6e/v7x (use 128 on v5e)


# ---------------------------------------------------------------------------
# Fused forward kernel (tabular branch + folded attention/fc stack)
# ---------------------------------------------------------------------------
def _fused_forward_kernel(tab_ref, tab_w_ref, wfused_ref, fc2_w_ref,
                          fc3_w_ref, fc4_w_ref, bias_ref, out_ref):
    def affine(x, w_ref, b, relu=False):
        y = jnp.dot(x.astype(jnp.bfloat16), w_ref[...],
                    preferred_element_type=jnp.float32) + b
        return jnp.maximum(y, 0.0) if relu else y

    # synthetic TabTransformer feature extractor (extract_features=True -> 1024)
    tab_feat = affine(tab_ref[...], tab_w_ref, bias_ref[:, 0:1024], relu=True)

    # cross attention (seq_len==1, shared weights, value=tab) + concat + fc1,
    # all pre-folded into a single (1024, 512) matmul at init:
    #   h1 = relu(concat([ca, ca]) @ Wfc1 + bfc1)
    #      = relu(tab_feat @ (Wv @ Wo @ (Wfc1[:1024]+Wfc1[1024:])) + b_fused)
    h = affine(tab_feat, wfused_ref, bias_ref[:, 1024:1536], relu=True)   # (tb, 512)

    h = affine(h, fc2_w_ref, bias_ref[:, 1536:1792], relu=True)           # (tb, 256)
    h = affine(h, fc3_w_ref, bias_ref[:, 1792:1920], relu=True)           # (tb, 128)
    out_ref[...] = affine(h, fc4_w_ref, bias_ref[:, 1920:2048])           # (tb, 128)


# ---------------------------------------------------------------------------
# Parameter init (deterministic, synthetic; folds done once in f32)
# ---------------------------------------------------------------------------
def _linear_init(key, fan_in, fan_out):
    kw, kb = jax.random.split(key)
    bound = 1.0 / math.sqrt(fan_in)
    w = jax.random.uniform(kw, (fan_in, fan_out), jnp.float32, -bound, bound)
    b = jax.random.uniform(kb, (fan_out,), jnp.float32, -bound, bound)
    return w, b


def init_params(key):
    ks = jax.random.split(key, 8)

    # tabular branch (synthetic)
    cat_emb = jax.random.normal(ks[0], (NUM_CAT, CAT_VOCAB, CAT_EMBED), jnp.float32) * 0.02
    tab_w, tab_b = _linear_init(ks[1], TAB_IN_DIM, TABLE_OUT_DIM)

    # shared nn.MultiheadAttention(1024, 8): with seq_len==1 only the value and
    # output projections reach the output (softmax over one key == 1).
    wv, bv = _linear_init(ks[2], TABLE_OUT_DIM, TABLE_OUT_DIM)
    wo, bo = _linear_init(ks[3], TABLE_OUT_DIM, TABLE_OUT_DIM)

    # fc: 2048 -> 512 -> 256 -> 128 -> num_classes
    fc1_w, fc1_b = _linear_init(ks[4], 2 * TABLE_OUT_DIM, 512)
    fc2_w, fc2_b = _linear_init(ks[5], 512, 256)
    fc3_w, fc3_b = _linear_init(ks[6], 256, 128)
    fc4_w, fc4_b = _linear_init(ks[7], 128, NUM_CLASSES)

    # --- exact (real-arithmetic) weight folds, once in f32 ---
    # concat([ca, ca]) @ fc1_w  ==  ca @ (fc1_w[:1024] + fc1_w[1024:])
    fc1_sum = fc1_w[:TABLE_OUT_DIM] + fc1_w[TABLE_OUT_DIM:]                 # (1024, 512)
    # ca = (tab_feat @ Wv + bv) @ Wo + bo  (no nonlinearity)  =>  compose with fc1
    w_fused = wv @ wo @ fc1_sum                                             # (1024, 512)
    b_fused = (bv @ wo + bo) @ fc1_sum + fc1_b                              # (512,)

    biases = jnp.concatenate(
        [tab_b, b_fused, fc2_b, fc3_b,
         jnp.pad(fc4_b, (0, OUT_PAD - NUM_CLASSES))]).reshape(1, BIAS_PACK)

    return {
        "cat_emb": cat_emb,
        "tab_w": jnp.pad(tab_w, ((0, TAB_IN_PAD - TAB_IN_DIM), (0, 0))).astype(jnp.bfloat16),
        "w_fused": w_fused.astype(jnp.bfloat16),
        "fc2_w": fc2_w.astype(jnp.bfloat16),
        "fc3_w": fc3_w.astype(jnp.bfloat16),
        "fc4_w": jnp.pad(fc4_w, ((0, 0), (0, OUT_PAD - NUM_CLASSES))).astype(jnp.bfloat16),
        "biases": biases,                       # f32 (1, 2048)
    }


# ---------------------------------------------------------------------------
# Forward pass (embedding gather + pad outside; one gridded pallas_call)
# ---------------------------------------------------------------------------
@jax.jit
def forward(params, image, cat_text, cont_text):
    # `image` never reaches the output: both attention calls use
    # value=tabular_features and seq_len==1, so the image branch is exactly dead.
    del image
    B = cat_text.shape[0]

    if B <= MAX_TILE_B:
        b_pad = max(8, ((B + 7) // 8) * 8)
        tile_b = b_pad
    else:
        tile_b = MAX_TILE_B
        b_pad = ((B + MAX_TILE_B - 1) // MAX_TILE_B) * MAX_TILE_B

    # tabular inputs: embedding gather (data-dependent) stays in plain JAX
    cat_e = params["cat_emb"][jnp.arange(NUM_CAT)[None, :], cat_text]       # (B, 7, 64)
    tab = jnp.concatenate([cat_e.reshape(B, NUM_CAT * CAT_EMBED),
                           cont_text.astype(jnp.float32)], axis=1)          # (B, 451)
    tab = jnp.pad(tab, ((0, b_pad - B), (0, TAB_IN_PAD - TAB_IN_DIM))).astype(jnp.bfloat16)

    out = pl.pallas_call(
        _fused_forward_kernel,
        out_shape=jax.ShapeDtypeStruct((b_pad, OUT_PAD), jnp.float32),
        grid=(b_pad // tile_b,),
        in_specs=[
            pl.BlockSpec((tile_b, TAB_IN_PAD), lambda i: (i, 0)),            # activations
            pl.BlockSpec((TAB_IN_PAD, TABLE_OUT_DIM), lambda i: (0, 0)),     # tab_w (resident)
            pl.BlockSpec((TABLE_OUT_DIM, 512), lambda i: (0, 0)),            # folded Wv@Wo@fc1
            pl.BlockSpec((512, 256), lambda i: (0, 0)),                      # fc2
            pl.BlockSpec((256, 128), lambda i: (0, 0)),                      # fc3
            pl.BlockSpec((128, OUT_PAD), lambda i: (0, 0)),                  # fc4
            pl.BlockSpec((1, BIAS_PACK), lambda i: (0, 0)),                  # packed biases
        ],
        out_specs=pl.BlockSpec((tile_b, OUT_PAD), lambda i: (i, 0)),
        compiler_params=pltpu.CompilerParams(
            dimension_semantics=("parallel",),
            vmem_limit_bytes=32 * 1024 * 1024,   # ~2.4 MB weights + tiles; well under v7x 64 MiB
        ),
    )(tab, params["tab_w"], params["w_fused"], params["fc2_w"],
      params["fc3_w"], params["fc4_w"], params["biases"])

    return out[:B, :NUM_CLASSES]


if __name__ == "__main__":
    key = jax.random.PRNGKey(0)
    k_param, k_img, k_cat, k_cont = jax.random.split(key, 4)

    params = init_params(k_param)

    B = 2
    image = jax.random.normal(k_img, (B, IMG_C, IMG_H, IMG_W), jnp.float32)
    cat_text = jax.random.randint(k_cat, (B, NUM_CAT), 0, CAT_VOCAB, jnp.int32)
    cont_text = jax.random.normal(k_cont, (B, NUM_CONT), jnp.float32)

    out = jax.block_until_ready(forward(params, image, cat_text, cont_text))
    assert out.shape == (B, NUM_CLASSES), out.shape
    assert bool(jnp.all(jnp.isfinite(out)))
    print("KERNEL_OK")
</pallas_src>

<mosaic_0001>
module attributes {stable_mosaic.version = 11 : i64} {
  func.func @_fused_forward_kernel(%arg0: i32, %arg1: memref<8x512xbf16, #tpu.memory_space<vmem>>, %arg2: memref<512x1024xbf16, #tpu.memory_space<vmem>>, %arg3: memref<1024x512xbf16, #tpu.memory_space<vmem>>, %arg4: memref<512x256xbf16, #tpu.memory_space<vmem>>, %arg5: memref<256x128xbf16, #tpu.memory_space<vmem>>, %arg6: memref<128x128xbf16, #tpu.memory_space<vmem>>, %arg7: memref<1x2048xf32, #tpu.memory_space<vmem>>, %arg8: memref<8x128xf32, #tpu.memory_space<vmem>>) attributes {dimension_semantics = [#tpu.dimension_semantics<parallel>], iteration_bounds = array<i64: 1>, scalar_prefetch = 0 : i64, scratch_operands = 0 : i64, tpu.core_type = #tpu.core_type<tc>, window_params = [{transform_indices = @transform_0, window_bounds = array<i64: 8, 512>}, {pipeline_mode = #tpu.pipeline_mode<synchronous>, transform_indices = @transform_1, window_bounds = array<i64: 512, 1024>}, {pipeline_mode = #tpu.pipeline_mode<synchronous>, transform_indices = @transform_2, window_bounds = array<i64: 1024, 512>}, {pipeline_mode = #tpu.pipeline_mode<synchronous>, transform_indices = @transform_3, window_bounds = array<i64: 512, 256>}, {pipeline_mode = #tpu.pipeline_mode<synchronous>, transform_indices = @transform_4, window_bounds = array<i64: 256, 128>}, {pipeline_mode = #tpu.pipeline_mode<synchronous>, transform_indices = @transform_5, window_bounds = array<i64: 128, 128>}, {pipeline_mode = #tpu.pipeline_mode<synchronous>, transform_indices = @transform_6, window_bounds = array<i64: 1, 2048>}, {transform_indices = @transform_7, window_bounds = array<i64: 8, 128>}]} {
    %c0 = arith.constant 0 : index
    %c0_0 = arith.constant 0 : index
    %0 = vector.load %arg1[%c0, %c0_0] : memref<8x512xbf16, #tpu.memory_space<vmem>>, vector<8x512xbf16>
    %c0_1 = arith.constant 0 : index
    %c0_2 = arith.constant 0 : index
    %1 = vector.load %arg7[%c0_1, %c0_2] : memref<1x2048xf32, #tpu.memory_space<vmem>>, vector<1x1024xf32>
    %c0_3 = arith.constant 0 : index
    %c0_4 = arith.constant 0 : index
    %2 = vector.load %arg2[%c0_3, %c0_4] : memref<512x1024xbf16, #tpu.memory_space<vmem>>, vector<512x1024xbf16>
    %cst = arith.constant dense<0.000000e+00> : vector<8x1024xf32>
    %3 = tpu.matmul %0, %2, %cst {dimension_numbers = #tpu.dot_dimension_numbers<[1], [0], [0], [1], [0, 0, 1, 1], [], []>} : vector<8x512xbf16>, vector<512x1024xbf16>, vector<8x1024xf32> -> vector<8x1024xf32>
    %4 = vector.broadcast %1 : vector<1x1024xf32> to vector<8x1024xf32>
    %5 = arith.addf %3, %4 : vector<8x1024xf32>
    %cst_5 = arith.constant 0.000000e+00 : f32
    %6 = vector.broadcast %cst_5 : f32 to vector<8x1024xf32>
    %7 = arith.maximumf %5, %6 : vector<8x1024xf32>
    %c0_6 = arith.constant 0 : index
    %c1024 = arith.constant 1024 : index
    %8 = vector.load %arg7[%c0_6, %c1024] : memref<1x2048xf32, #tpu.memory_space<vmem>>, vector<1x512xf32>
    %9 = arith.truncf %7 : vector<8x1024xf32> to vector<8x1024xbf16>
    %c0_7 = arith.constant 0 : index
    %c0_8 = arith.constant 0 : index
    %10 = vector.load %arg3[%c0_7, %c0_8] : memref<1024x512xbf16, #tpu.memory_space<vmem>>, vector<1024x512xbf16>
    %cst_9 = arith.constant dense<0.000000e+00> : vector<8x512xf32>
    %11 = tpu.matmul %9, %10, %cst_9 {dimension_numbers = #tpu.dot_dimension_numbers<[1], [0], [0], [1], [0, 0, 1, 1], [], []>} : vector<8x1024xbf16>, vector<1024x512xbf16>, vector<8x512xf32> -> vector<8x512xf32>
    %12 = vector.broadcast %8 : vector<1x512xf32> to vector<8x512xf32>
    %13 = arith.addf %11, %12 : vector<8x512xf32>
    %cst_10 = arith.constant 0.000000e+00 : f32
    %14 = vector.broadcast %cst_10 : f32 to vector<8x512xf32>
    %15 = arith.maximumf %13, %14 : vector<8x512xf32>
    %c0_11 = arith.constant 0 : index
    %c1536 = arith.constant 1536 : index
    %16 = vector.load %arg7[%c0_11, %c1536] : memref<1x2048xf32, #tpu.memory_space<vmem>>, vector<1x256xf32>
    %17 = arith.truncf %15 : vector<8x512xf32> to vector<8x512xbf16>
    %c0_12 = arith.constant 0 : index
    %c0_13 = arith.constant 0 : index
    %18 = vector.load %arg4[%c0_12, %c0_13] : memref<512x256xbf16, #tpu.memory_space<vmem>>, vector<512x256xbf16>
    %cst_14 = arith.constant dense<0.000000e+00> : vector<8x256xf32>
    %19 = tpu.matmul %17, %18, %cst_14 {dimension_numbers = #tpu.dot_dimension_numbers<[1], [0], [0], [1], [0, 0, 1, 1], [], []>} : vector<8x512xbf16>, vector<512x256xbf16>, vector<8x256xf32> -> vector<8x256xf32>
    %20 = vector.broadcast %16 : vector<1x256xf32> to vector<8x256xf32>
    %21 = arith.addf %19, %20 : vector<8x256xf32>
    %cst_15 = arith.constant 0.000000e+00 : f32
    %22 = vector.broadcast %cst_15 : f32 to vector<8x256xf32>
    %23 = arith.maximumf %21, %22 : vector<8x256xf32>
    %c0_16 = arith.constant 0 : index
    %c1792 = arith.constant 1792 : index
    %24 = vector.load %arg7[%c0_16, %c1792] : memref<1x2048xf32, #tpu.memory_space<vmem>>, vector<1x128xf32>
    %25 = arith.truncf %23 : vector<8x256xf32> to vector<8x256xbf16>
    %c0_17 = arith.constant 0 : index
    %c0_18 = arith.constant 0 : index
    %26 = vector.load %arg5[%c0_17, %c0_18] : memref<256x128xbf16, #tpu.memory_space<vmem>>, vector<256x128xbf16>
    %cst_19 = arith.constant dense<0.000000e+00> : vector<8x128xf32>
    %27 = tpu.matmul %25, %26, %cst_19 {dimension_numbers = #tpu.dot_dimension_numbers<[1], [0], [0], [1], [0, 0, 1, 1], [], []>} : vector<8x256xbf16>, vector<256x128xbf16>, vector<8x128xf32> -> vector<8x128xf32>
    %28 = vector.broadcast %24 : vector<1x128xf32> to vector<8x128xf32>
    %29 = arith.addf %27, %28 : vector<8x128xf32>
    %cst_20 = arith.constant 0.000000e+00 : f32
    %30 = vector.broadcast %cst_20 : f32 to vector<8x128xf32>
    %31 = arith.maximumf %29, %30 : vector<8x128xf32>
    %c0_21 = arith.constant 0 : index
    %c1920 = arith.constant 1920 : index
    %32 = vector.load %arg7[%c0_21, %c1920] : memref<1x2048xf32, #tpu.memory_space<vmem>>, vector<1x128xf32>
    %33 = arith.truncf %31 : vector<8x128xf32> to vector<8x128xbf16>
    %c0_22 = arith.constant 0 : index
    %c0_23 = arith.constant 0 : index
    %34 = vector.load %arg6[%c0_22, %c0_23] : memref<128x128xbf16, #tpu.memory_space<vmem>>, vector<128x128xbf16>
    %cst_24 = arith.constant dense<0.000000e+00> : vector<8x128xf32>
    %35 = tpu.matmul %33, %34, %cst_24 {dimension_numbers = #tpu.dot_dimension_numbers<[1], [0], [0], [1], [0, 0, 1, 1], [], []>} : vector<8x128xbf16>, vector<128x128xbf16>, vector<8x128xf32> -> vector<8x128xf32>
    %36 = vector.broadcast %32 : vector<1x128xf32> to vector<8x128xf32>
    %37 = arith.addf %35, %36 : vector<8x128xf32>
    %c0_25 = arith.constant 0 : index
    %c0_26 = arith.constant 0 : index
    %38 = vector.load %arg8[%c0_25, %c0_26] : memref<8x128xf32, #tpu.memory_space<vmem>>, vector<8x128xf32>
    tpu.vector_store %arg8[%c0_25, %c0_26], %37 {strides = array<i32>} : memref<8x128xf32, #tpu.memory_space<vmem>>, vector<8x128xf32>,
    return
  }
  func.func @transform_0(%arg0: i32) -> (i32, i32) {
    %c0_i32 = arith.constant 0 : i32
    %c0_i32_0 = arith.constant 0 : i32
    return %arg0, %c0_i32 : i32, i32
  }
  func.func @transform_1(%arg0: i32) -> (i32, i32) {
    %c0_i32 = arith.constant 0 : i32
    %c0_i32_0 = arith.constant 0 : i32
    %c0_i32_1 = arith.constant 0 : i32
    return %c0_i32, %c0_i32_0 : i32, i32
  }
  func.func @transform_2(%arg0: i32) -> (i32, i32) {
    %c0_i32 = arith.constant 0 : i32
    %c0_i32_0 = arith.constant 0 : i32
    %c0_i32_1 = arith.constant 0 : i32
    return %c0_i32, %c0_i32_0 : i32, i32
  }
  func.func @transform_3(%arg0: i32) -> (i32, i32) {
    %c0_i32 = arith.constant 0 : i32
    %c0_i32_0 = arith.constant 0 : i32
    %c0_i32_1 = arith.constant 0 : i32
    return %c0_i32, %c0_i32_0 : i32, i32
  }
  func.func @transform_4(%arg0: i32) -> (i32, i32) {
    %c0_i32 = arith.constant 0 : i32
    %c0_i32_0 = arith.constant 0 : i32
    %c0_i32_1 = arith.constant 0 : i32
    return %c0_i32, %c0_i32_0 : i32, i32
  }
  func.func @transform_5(%arg0: i32) -> (i32, i32) {
    %c0_i32 = arith.constant 0 : i32
    %c0_i32_0 = arith.constant 0 : i32
    %c0_i32_1 = arith.constant 0 : i32
    return %c0_i32, %c0_i32_0 : i32, i32
  }
  func.func @transform_6(%arg0: i32) -> (i32, i32) {
    %c0_i32 = arith.constant 0 : i32
    %c0_i32_0 = arith.constant 0 : i32
    %c0_i32_1 = arith.constant 0 : i32
    return %c0_i32, %c0_i32_0 : i32, i32
  }
  func.func @transform_7(%arg0: i32) -> (i32, i32) {
    %c0_i32 = arith.constant 0 : i32
    %c0_i32_0 = arith.constant 0 : i32
    return %arg0, %c0_i32 : i32, i32
  }
}

</mosaic_0001>

<bundles_post_ra>
// kernel: forward.1
= control target key start
LH: loop header
LB: loop body
LE: loop exit
PB: predicated region body
PF: predicated region fallthrough
CT: control target
= control target key end

     0   :  { %12 = vsyncpa [#allocation3], 0  ;;  %s6318_s0 = inlined_call_operand.vmem [shape: bf16[8,512], index: 0, kind: input, shape index: {}]   ;;  %s6319_s1 = inlined_call_operand.hbm [shape: bf16[512,1024], index: 1, kind: input, shape index: {}]   ;;  %s6320_s2 = inlined_call_operand.hbm [shape: bf16[1024,512], index: 2, kind: input, shape index: {}]   ;;  %s6321_s3 = inlined_call_operand.hbm [shape: bf16[512,256], index: 3, kind: input, shape index: {}]   ;;  %s6322_s4 = inlined_call_operand.vmem [shape: bf16[256,128], index: 4, kind: input, shape index: {}]   ;;  %s6323_s5 = inlined_call_operand.hbm [shape: bf16[128,128], index: 5, kind: input, shape index: {}]   ;;  %s6324_s6 = inlined_call_operand.hbm [shape: f32[1,2048], index: 6, kind: input, shape index: {}]   ;;  %s6325_s7 = inlined_call_operand.vmem [shape: f32[8,128], index: 7, kind: output, shape index: {}]  }
   0x1   :  { %13 = vsyncpa [#allocation5], 0 }
   0x2   :  { %14 = vsyncpa [#allocation8], 0  ;;  %s6057_s24 = smov [#allocation4]   ;;  %s5941_s28 = scalar_lea.hbm %s6320_s2, 32768 }
   0x3   :  { %s34_s25 = sshll.u32 %s6057_s24, 4  ;;  %p5942_p0 = scmp.ne.s32.totalorder %s6320_s2, %s5941_s28  ;;  %s35_s25 = int_to_ptr.vmem [resolvable:$true] %s34_s25 }
   0x4   :  { %p5945_p1 = scmp.lt.u32.totalorder %s5941_s28, %s6320_s2 }
   0x6   :  { %p5947_p2 = pnand %p5945_p1, %p5942_p0 }
   0x8   :  { %5950 = shalt.err (!%p5947_p2)
}
   0x9   :  { %s5951_s10 = scalar_lea.vmem %s35_s25, 32768  ;;  %p5956_p4 = scmp.lt.s32.totalorder %s35_s25, %s35_s25 }
   0xa   :  { %p5952_p3 = scmp.ne.s32.totalorder %s35_s25, %s5951_s10  ;;  %p5957_p5 = scmp.lt.s32.totalorder %s5951_s10, %s5951_s10 }
   0xc   :  { %p5958_p6 = por %p5957_p5, %p5956_p4 }
   0xe   :  { %p5959_p7 = pnand %p5958_p6, %p5952_p3 }
  0x10   :  { %5962 = shalt.err (!%p5959_p7)
}
  0x11   :  { %s6058_s11 = smov 256   ;;  %s6059_s12 = smov 16  }
  0x12   :  { %40 = dma.hbm_to_vmem [thread:$0]  %s6320_s2, 32768, %s35_s25, [#allocation5], %s6058_s11, %s6058_s11, %s6059_s12  }
  0x13   :  { %s6060_s15 = smov [#allocation7]   ;;  %s5963_s19 = scalar_lea.hbm %s6323_s5, 1024 }
  0x14   :  { %s60_s16 = sshll.u32 %s6060_s15, 4  ;;  %p5964_p8 = scmp.ne.s32.totalorder %s6323_s5, %s5963_s19  ;;  %s61_s16 = int_to_ptr.vmem [resolvable:$true] %s60_s16 }
  0x15   :  { %p5967_p9 = scmp.lt.u32.totalorder %s5963_s19, %s6323_s5 }
  0x17   :  { %p5969_p10 = pnand %p5967_p9, %p5964_p8 }
  0x19   :  { %5972 = shalt.err (!%p5969_p10)
}
  0x1a   :  { %s5973_s24 = scalar_lea.vmem %s61_s16, 1024  ;;  %p5978_p12 = scmp.lt.s32.totalorder %s61_s16, %s61_s16 }
  0x1b   :  { %p5974_p11 = scmp.ne.s32.totalorder %s61_s16, %s5973_s24  ;;  %p5979_p13 = scmp.lt.s32.totalorder %s5973_s24, %s5973_s24 }
  0x1d   :  { %p5980_p0 = por %p5979_p13, %p5978_p12 }
  0x1f   :  { %p5981_p1 = pnand %p5980_p0, %p5974_p11 }
  0x21   :  { %5984 = shalt.err (!%p5981_p1)
}
  0x22   :  { %s6061_s2 = smov 64   ;;  %s6062_s25 = smov 4  }
  0x23   :  { %66 = dma.hbm_to_vmem [thread:$0]  %s6323_s5, 1024, %s61_s16, [#allocation8], %s6061_s2, %s6061_s2, %s6062_s25  }
  0x24   :  { %s6063_s28 = smov [#allocation2]   ;;  %s5985_s9 = scalar_lea.hbm %s6319_s1, 32768 }
  0x25   :  { %s22_s29 = sshll.u32 %s6063_s28, 4  ;;  %p5986_p2 = scmp.ne.s32.totalorder %s6319_s1, %s5985_s9  ;;  %s23_s29 = int_to_ptr.vmem [resolvable:$true] %s22_s29 }
  0x26   :  { %p5989_p3 = scmp.lt.u32.totalorder %s5985_s9, %s6319_s1 }
  0x28   :  { %p5991_p4 = pnand %p5989_p3, %p5986_p2 }
  0x2a   :  { %5994 = shalt.err (!%p5991_p4)
}
  0x2b   :  { %s5995_s14 = scalar_lea.vmem %s23_s29, 32768  ;;  %p6000_p6 = scmp.lt.s32.totalorder %s23_s29, %s23_s29 }
  0x2c   :  { %p5996_p5 = scmp.ne.s32.totalorder %s23_s29, %s5995_s14  ;;  %p6001_p7 = scmp.lt.s32.totalorder %s5995_s14, %s5995_s14 }
  0x2e   :  { %p6002_p8 = por %p6001_p7, %p6000_p6 }
  0x30   :  { %p6003_p9 = pnand %p6002_p8, %p5996_p5 }
  0x32   :  { %6006 = shalt.err (!%p6003_p9)
}
  0x33   :  { %s6064_s5 = smov 512   ;;  %s6065_s15 = smov 32  }
  0x34   :  { %28 = dma.hbm_to_vmem [thread:$0]  %s6319_s1, 32768, %s23_s29, [#allocation3], %s6064_s5, %s6064_s5, %s6065_s15  }
  0x35   :  { %s6066_s18 = smov [#allocation6]   ;;  %s6007_s22 = scalar_lea.hbm %s6321_s3, 8192 }
  0x36   :  { %s46_s19 = sshll.u32 %s6066_s18, 4  ;;  %p6008_p10 = scmp.ne.s32.totalorder %s6321_s3, %s6007_s22  ;;  %s47_s19 = int_to_ptr.vmem [resolvable:$true] %s46_s19 }
  0x37   :  { %p6011_p11 = scmp.lt.u32.totalorder %s6007_s22, %s6321_s3 }
  0x39   :  { %p6013_p12 = pnand %p6011_p11, %p6008_p10 }
  0x3b   :  { %6016 = shalt.err (!%p6013_p12)
}
  0x3c   :  { %s6017_s26 = scalar_lea.vmem %s47_s19, 8192  ;;  %p6022_p0 = scmp.lt.s32.totalorder %s47_s19, %s47_s19 }
  0x3d   :  { %p6018_p13 = scmp.ne.s32.totalorder %s47_s19, %s6017_s26  ;;  %p6023_p1 = scmp.lt.s32.totalorder %s6017_s26, %s6017_s26 }
  0x3f   :  { %p6024_p2 = por %p6023_p1, %p6022_p0 }
  0x41   :  { %p6025_p3 = pnand %p6024_p2, %p6018_p13 }
  0x43   :  { %6028 = shalt.err (!%p6025_p3)
}
  0x44   :  { %s6067_s1 = smov 128   ;;  %s6068_s27 = smov 8  }
  0x45   :  { %52 = dma.hbm_to_vmem [thread:$0]  %s6321_s3, 8192, %s47_s19, [#allocation5], %s6067_s1, %s6067_s1, %s6068_s27  }
  0x46   :  { %s6069_s30 = smov [#allocation9]   ;;  %s6029_s11 = scalar_lea.hbm %s6324_s6, 256 }
  0x47   :  { %s73_s8 = sshll.u32 %s6069_s30, 4  ;;  %p6030_p4 = scmp.ne.s32.totalorder %s6324_s6, %s6029_s11  ;;  %s74_s8 = int_to_ptr.vmem [resolvable:$true] %s73_s8 }
  0x48   :  { %p6033_p5 = scmp.lt.u32.totalorder %s6029_s11, %s6324_s6 }
  0x4a   :  { %p6035_p6 = pnand %p6033_p5, %p6030_p4 }
  0x4c   :  { %6038 = shalt.err (!%p6035_p6)
}
  0x4d   :  { %s6039_s15 = scalar_lea.vmem %s74_s8, 256  ;;  %p6044_p8 = scmp.lt.s32.totalorder %s74_s8, %s74_s8 }
  0x4e   :  { %p6040_p7 = scmp.ne.s32.totalorder %s74_s8, %s6039_s15  ;;  %p6045_p9 = scmp.lt.s32.totalorder %s6039_s15, %s6039_s15 }
  0x50   :  { %p6046_p10 = por %p6045_p9, %p6044_p8 }
  0x52   :  { %p6047_p11 = pnand %p6046_p10, %p6040_p7 }
  0x54   :  { %6050 = shalt.err (!%p6047_p11)
}
  0x55   :  { %76 = dma.hbm_to_vmem [thread:$0]  %s6324_s6, 256, %s74_s8, [#allocation8]  }
  0x56   :  { %6051 = dma.done.wait [#allocation3], 32768  }
  0x57   :  { %6052 = vsyncadd [#allocation3], 4294934528 }
  0x58   :  { %6053 = dma.done.wait [#allocation5], 40960  }
  0x59   :  { %6054 = vsyncadd [#allocation5], 4294926336 }
  0x5a   :  { %6055 = dma.done.wait [#allocation8], 1280  }
  0x5b   :  { %6056 = vsyncadd [#allocation8], 4294966016  ;;  %v96_v0 = vld [vmem:[#allocation2] sm:$0xff]  ;;  %v97_v2 = vld [vmem:[#allocation2 + $0x8] sm:$0xff]  ;;  %vm6071_vm0 = vmmov 0  }
  0x5c   :  { %v100_v1 = vld [vmem:[#allocation2 + $0x20] sm:$0xff]  ;;  %v101_v4 = vld [vmem:[#allocation2 + $0x28] sm:$0xff] }
  0x5d   :  { %v4708_v3 = vcombine.high %v96_v0, %v100_v1  ;;  %v4707_v5 = vcombine.low %v96_v0, %v100_v1  ;;  %v104_v6 = vld [vmem:[#allocation2 + $0x40] sm:$0xff]  ;;  %v4710_v8 = vcombine.high %v97_v2, %v101_v4  ;;  %v4709_v9 = vcombine.low %v97_v2, %v101_v4  ;;  %v105_v11 = vld [vmem:[#allocation2 + $0x48] sm:$0xff] }
  0x5e   :  { %v108_v7 = vld [vmem:[#allocation2 + $0x60] sm:$0xff]  ;;  %v109_v12 = vld [vmem:[#allocation2 + $0x68] sm:$0xff] }
  0x5f   :  { %v4716_v10 = vcombine.high %v104_v6, %v108_v7  ;;  %v112_v13 = vld [vmem:[#allocation2 + $0x80] sm:$0xff]  ;;  %1687 = vmatprep.subr.bf16.mxu0 %v4708_v3  ;;  %v4718_v14 = vcombine.high %v105_v11, %v109_v12  ;;  %v113_v16 = vld [vmem:[#allocation2 + $0x88] sm:$0xff]  ;;  %1769 = vmatprep.subr.bf16.mxu1 %v4710_v8  ;;  %v4715_v18 = vcombine.low %v104_v6, %v108_v7 }
  0x60   :  { %v116_v15 = vld [vmem:[#allocation2 + $0xa0] sm:$0xff]  ;;  %v117_v17 = vld [vmem:[#allocation2 + $0xa8] sm:$0xff]  ;;  %1688 = vmatpush1.bf16.msra.mxu0 %v4707_v5  ;;  %1770 = vmatpush1.bf16.msra.mxu1 %v4709_v9  ;;  %v4717_v19 = vcombine.low %v105_v11, %v109_v12 }
  0x61   :  { %1689 = vmatprep.subr.bf16.mxu0 %v4716_v10  ;;  %v4724_v20 = vcombine.high %v112_v13, %v116_v15  ;;  %1771 = vmatprep.subr.bf16.mxu1 %v4718_v14  ;;  %v4726_v21 = vcombine.high %v113_v16, %v117_v17  ;;  %v120_v22 = vld [vmem:[#allocation2 + $0xc0] sm:$0xff]  ;;  %v121_v24 = vld [vmem:[#allocation2 + $0xc8] sm:$0xff]  ;;  %v4723_v26 = vcombine.low %v112_v13, %v116_v15 }
  0x62   :  { %v124_v23 = vld [vmem:[#allocation2 + $0xe0] sm:$0xff]  ;;  %v125_v25 = vld [vmem:[#allocation2 + $0xe8] sm:$0xff]  ;;  %v4725_v27 = vcombine.low %v113_v16, %v117_v17 }
  0x63   :  { %v4732_v28 = vcombine.high %v120_v22, %v124_v23  ;;  %v4734_v29 = vcombine.high %v121_v24, %v125_v25  ;;  %v128_v30 = vld [vmem:[#allocation2 + $0x100] sm:$0xff]  ;;  %v129_v32 = vld [vmem:[#allocation2 + $0x108] sm:$0xff]  ;;  %v4731_v34 = vcombine.low %v120_v22, %v124_v23  ;;  %v4733_v35 = vcombine.low %v121_v24, %v125_v25 }
  0x64   :  { %1690 = vmatpush1.bf16.msra.mxu0 %v4715_v18  ;;  %1772 = vmatpush1.bf16.msra.mxu1 %v4717_v19  ;;  %v132_v31 = vld [vmem:[#allocation2 + $0x120] sm:$0xff]  ;;  %v133_v33 = vld [vmem:[#allocation2 + $0x128] sm:$0xff] }
  0x65   :  { %1691 = vmatprep.subr.bf16.mxu0 %v4724_v20  ;;  %1773 = vmatprep.subr.bf16.mxu1 %v4726_v21  ;;  %v4740_v36 = vcombine.high %v128_v30, %v132_v31  ;;  %v4742_v37 = vcombine.high %v129_v32, %v133_v33  ;;  %v136_v38 = vld [vmem:[#allocation2 + $0x140] sm:$0xff]  ;;  %v137_v40 = vld [vmem:[#allocation2 + $0x148] sm:$0xff]  ;;  %v4739_v42 = vcombine.low %v128_v30, %v132_v31 }
  0x66   :  { %v140_v39 = vld [vmem:[#allocation2 + $0x160] sm:$0xff]  ;;  %v141_v41 = vld [vmem:[#allocation2 + $0x168] sm:$0xff]  ;;  %v4741_v43 = vcombine.low %v129_v32, %v133_v33 }
  0x67   :  { %v4748_v44 = vcombine.high %v136_v38, %v140_v39  ;;  %v4750_v45 = vcombine.high %v137_v40, %v141_v41  ;;  %v144_v46 = vld [vmem:[#allocation2 + $0x180] sm:$0xff]  ;;  %v145_v48 = vld [vmem:[#allocation2 + $0x188] sm:$0xff]  ;;  %v4747_v50 = vcombine.low %v136_v38, %v140_v39  ;;  %v4749_v51 = vcombine.low %v137_v40, %v141_v41 }
  0x68   :  { %1692 = vmatpush1.bf16.msra.mxu0 %v4723_v26  ;;  %1774 = vmatpush1.bf16.msra.mxu1 %v4725_v27  ;;  %v148_v47 = vld [vmem:[#allocation2 + $0x1a0] sm:$0xff]  ;;  %v149_v49 = vld [vmem:[#allocation2 + $0x1a8] sm:$0xff] }
  0x69   :  { %1693 = vmatprep.subr.bf16.mxu0 %v4732_v28  ;;  %1775 = vmatprep.subr.bf16.mxu1 %v4734_v29  ;;  %v4756_v52 = vcombine.high %v144_v46, %v148_v47  ;;  %v6175_v53 = vld [vmem:[%s6318_s0] sm:$0xff]  ;;  %v4758_v54 = vcombine.high %v145_v48, %v149_v49  ;;  %v153_v58 = vld [vmem:[#allocation2 + $0x1c8] sm:$0xff]  ;;  %v4755_v60 = vcombine.low %v144_v46, %v148_v47 }
  0x6a   :  { %v152_v55 = vld [vmem:[#allocation2 + $0x1c0] sm:$0xff]  ;;  %v6179_v57 = vcombine.high %v6175_v53, %v6175_v53  ;;  %v157_v59 = vld [vmem:[#allocation2 + $0x1e8] sm:$0xff]  ;;  %v4757_v61 = vcombine.low %v145_v48, %v149_v49 }
  0x6b   :  { %v156_v56 = vld [vmem:[#allocation2 + $0x1e0] sm:$0xff]  ;;  %v4766_v63 = vcombine.high %v153_v58, %v157_v59  ;;  %v161_v2 = vld [vmem:[#allocation2 + $0x208] sm:$0xff]  ;;  %v4765_v5 = vcombine.low %v153_v58, %v157_v59 }
  0x6c   :  { %1694 = vmatpush1.bf16.msra.mxu0 %v4731_v34  ;;  %1776 = vmatpush1.bf16.msra.mxu1 %v4733_v35  ;;  %v4764_v62 = vcombine.high %v152_v55, %v156_v56  ;;  %v160_v0 = vld [vmem:[#allocation2 + $0x200] sm:$0xff]  ;;  %v165_v3 = vld [vmem:[#allocation2 + $0x228] sm:$0xff]  ;;  %v4763_v4 = vcombine.low %v152_v55, %v156_v56 }
  0x6d   :  { %1695 = vmatprep.subr.bf16.mxu0 %v4740_v36  ;;  %1777 = vmatprep.subr.bf16.mxu1 %v4742_v37  ;;  %v164_v1 = vld [vmem:[#allocation2 + $0x220] sm:$0xff]  ;;  %v4774_v7 = vcombine.high %v161_v2, %v165_v3  ;;  %v169_v10 = vld [vmem:[#allocation2 + $0x248] sm:$0xff]  ;;  %v4773_v13 = vcombine.low %v161_v2, %v165_v3 }
  0x6e   :  { %1719 = vmatprep.mubr.bf16.mxu0 %v6179_v57  ;;  %1801 = vmatprep.mubr.bf16.mxu1 %v6179_v57  ;;  %v4772_v6 = vcombine.high %v160_v0, %v164_v1  ;;  %v168_v8 = vld [vmem:[#allocation2 + $0x240] sm:$0xff]  ;;  %v173_v11 = vld [vmem:[#allocation2 + $0x268] sm:$0xff]  ;;  %v4771_v12 = vcombine.low %v160_v0, %v164_v1 }
  0x6f   :  { %v172_v9 = vld [vmem:[#allocation2 + $0x260] sm:$0xff]  ;;  %v4782_v15 = vcombine.high %v169_v10, %v173_v11  ;;  %v177_v18 = vld [vmem:[#allocation2 + $0x288] sm:$0xff]  ;;  %v4781_v21 = vcombine.low %v169_v10, %v173_v11 }
  0x70   :  { %1696 = vmatpush1.bf16.msra.mxu0 %v4739_v42  ;;  %1778 = vmatpush1.bf16.msra.mxu1 %v4741_v43  ;;  %v4780_v14 = vcombine.high %v168_v8, %v172_v9  ;;  %v176_v16 = vld [vmem:[#allocation2 + $0x280] sm:$0xff]  ;;  %v181_v19 = vld [vmem:[#allocation2 + $0x2a8] sm:$0xff]  ;;  %v4779_v20 = vcombine.low %v168_v8, %v172_v9 }
  0x71   :  { %1697 = vmatprep.subr.bf16.mxu0 %v4748_v44  ;;  %1779 = vmatprep.subr.bf16.mxu1 %v4750_v45  ;;  %v180_v17 = vld [vmem:[#allocation2 + $0x2a0] sm:$0xff]  ;;  %v4790_v23 = vcombine.high %v177_v18, %v181_v19  ;;  %v185_v26 = vld [vmem:[#allocation2 + $0x2c8] sm:$0xff]  ;;  %v4789_v29 = vcombine.low %v177_v18, %v181_v19 }
  0x72   :  { %v4788_v22 = vcombine.high %v176_v16, %v180_v17  ;;  %v184_v24 = vld [vmem:[#allocation2 + $0x2c0] sm:$0xff]  ;;  %v189_v27 = vld [vmem:[#allocation2 + $0x2e8] sm:$0xff]  ;;  %v4787_v28 = vcombine.low %v176_v16, %v180_v17 }
  0x73   :  { %v188_v25 = vld [vmem:[#allocation2 + $0x2e0] sm:$0xff]  ;;  %v4798_v31 = vcombine.high %v185_v26, %v189_v27  ;;  %v193_v34 = vld [vmem:[#allocation2 + $0x308] sm:$0xff]  ;;  %v4797_v37 = vcombine.low %v185_v26, %v189_v27 }
  0x74   :  { %1698 = vmatpush1.bf16.msra.mxu0 %v4747_v50  ;;  %1780 = vmatpush1.bf16.msra.mxu1 %v4749_v51  ;;  %v4796_v30 = vcombine.high %v184_v24, %v188_v25  ;;  %v192_v32 = vld [vmem:[#allocation2 + $0x300] sm:$0xff]  ;;  %v197_v35 = vld [vmem:[#allocation2 + $0x328] sm:$0xff]  ;;  %v4795_v36 = vcombine.low %v184_v24, %v188_v25 }
  0x75   :  { %1699 = vmatprep.subr.bf16.mxu0 %v4756_v52  ;;  %1781 = vmatprep.subr.bf16.mxu1 %v4758_v54  ;;  %v196_v33 = vld [vmem:[#allocation2 + $0x320] sm:$0xff]  ;;  %v4806_v39 = vcombine.high %v193_v34, %v197_v35  ;;  %v201_v42 = vld [vmem:[#allocation2 + $0x348] sm:$0xff]  ;;  %v4805_v45 = vcombine.low %v193_v34, %v197_v35 }
  0x76   :  { %v4804_v38 = vcombine.high %v192_v32, %v196_v33  ;;  %v200_v40 = vld [vmem:[#allocation2 + $0x340] sm:$0xff]  ;;  %v205_v43 = vld [vmem:[#allocation2 + $0x368] sm:$0xff]  ;;  %v4803_v44 = vcombine.low %v192_v32, %v196_v33 }
  0x77   :  { %v204_v41 = vld [vmem:[#allocation2 + $0x360] sm:$0xff]  ;;  %v4814_v47 = vcombine.high %v201_v42, %v205_v43  ;;  %v209_v50 = vld [vmem:[#allocation2 + $0x388] sm:$0xff]  ;;  %v4813_v54 = vcombine.low %v201_v42, %v205_v43 }
  0x78   :  { %1700 = vmatpush1.bf16.msra.mxu0 %v4755_v60  ;;  %1782 = vmatpush1.bf16.msra.mxu1 %v4757_v61  ;;  %v4812_v46 = vcombine.high %v200_v40, %v204_v41  ;;  %v208_v48 = vld [vmem:[#allocation2 + $0x380] sm:$0xff]  ;;  %v213_v51 = vld [vmem:[#allocation2 + $0x3a8] sm:$0xff]  ;;  %v4811_v52 = vcombine.low %v200_v40, %v204_v41 }
  0x79   :  { %1701 = vmatprep.subr.bf16.mxu0 %v4764_v62  ;;  %1783 = vmatprep.subr.bf16.mxu1 %v4766_v63  ;;  %v212_v49 = vld [vmem:[#allocation2 + $0x3a0] sm:$0xff]  ;;  %v4822_v56 = vcombine.high %v209_v50, %v213_v51  ;;  %v217_v60 = vld [vmem:[#allocation2 + $0x3c8] sm:$0xff]  ;;  %v4821_v63 = vcombine.low %v209_v50, %v213_v51 }
  0x7a   :  { %v4820_v55 = vcombine.high %v208_v48, %v212_v49  ;;  %v216_v58 = vld [vmem:[#allocation2 + $0x3c0] sm:$0xff]  ;;  %v221_v61 = vld [vmem:[#allocation2 + $0x3e8] sm:$0xff]  ;;  %v4819_v62 = vcombine.low %v208_v48, %v212_v49 }
  0x7b   :  { %v220_v59 = vld [vmem:[#allocation2 + $0x3e0] sm:$0xff]  ;;  %v4830_v1 = vcombine.high %v217_v60, %v221_v61 }
  0x7c   :  { %1702 = vmatpush1.bf16.msra.mxu0 %v4763_v4  ;;  %1784 = vmatpush1.bf16.msra.mxu1 %v4765_v5  ;;  %v4828_v0 = vcombine.high %v216_v58, %v220_v59  ;;  %v224_v2 = vld [vmem:[#allocation2 + $0x400] sm:$0xff]  ;;  %v225_v4 = vld [vmem:[#allocation2 + $0x408] sm:$0xff] }
  0x7d   :  { %1703 = vmatprep.subr.bf16.mxu0 %v4772_v6  ;;  %1785 = vmatprep.subr.bf16.mxu1 %v4774_v7  ;;  %v228_v3 = vld [vmem:[#allocation2 + $0x420] sm:$0xff]  ;;  %v229_v5 = vld [vmem:[#allocation2 + $0x428] sm:$0xff]  ;;  %v4827_v6 = vcombine.low %v216_v58, %v220_v59  ;;  %v4829_v7 = vcombine.low %v217_v60, %v221_v61 }
  0x7e   :  { %v4836_v8 = vcombine.high %v224_v2, %v228_v3  ;;  %v4838_v9 = vcombine.high %v225_v4, %v229_v5  ;;  %v232_v10 = vld [vmem:[#allocation2 + $0x440] sm:$0xff]  ;;  %v4835_v16 = vcombine.low %v224_v2, %v228_v3  ;;  %v4837_v17 = vcombine.low %v225_v4, %v229_v5 }
  0x7f   :  { %v236_v11 = vld [vmem:[#allocation2 + $0x460] sm:$0xff] }
  0x80   :  { %1704 = vmatpush1.bf16.msra.mxu0 %v4771_v12  ;;  %1786 = vmatpush1.bf16.msra.mxu1 %v4773_v13  ;;  %v6185_v12 = vcombine.low %v6175_v53, %v6175_v53  ;;  %v233_v13 = vld [vmem:[#allocation2 + $0x448] sm:$0xff]  ;;  %v4844_v18 = vcombine.high %v232_v10, %v236_v11  ;;  %v240_v19 = vld [vmem:[#allocation2 + $0x480] sm:$0xff]  ;;  %v4843_v24 = vcombine.low %v232_v10, %v236_v11 }
  0x81   :  { %1705 = vmatprep.subr.bf16.mxu0 %v4780_v14  ;;  %1787 = vmatprep.subr.bf16.mxu1 %v4782_v15  ;;  %v237_v14 = vld [vmem:[#allocation2 + $0x468] sm:$0xff]  ;;  %v248_v27 = vld [vmem:[#allocation2 + $0x4c0] sm:$0xff] }
  0x82   :  { %v6190_v15 = vld [vmem:[%s6318_s0 + $0x8] sm:$0xff]  ;;  %v4845_v25 = vcombine.low %v233_v13, %v237_v14  ;;  %v256_v35 = vld [vmem:[#allocation2 + $0x500] sm:$0xff] }
  0x83   :  { %v245_v53 = vld [vmem:[#allocation2 + $0x4a8] sm:$0xff]  ;;  %v264_v43 = vld [vmem:[#allocation2 + $0x540] sm:$0xff] }
  0x84   :  { %1706 = vmatpush1.bf16.msra.mxu0 %v4779_v20  ;;  %1788 = vmatpush1.bf16.msra.mxu1 %v4781_v21  ;;  %v244_v20 = vld [vmem:[#allocation2 + $0x4a0] sm:$0xff]  ;;  %v241_v21 = vld [vmem:[#allocation2 + $0x488] sm:$0xff] }
  0x85   :  { %1707 = vmatprep.subr.bf16.mxu0 %v4788_v22  ;;  %1789 = vmatprep.subr.bf16.mxu1 %v4790_v23  ;;  %v4846_v22 = vcombine.high %v233_v13, %v237_v14  ;;  %v6194_v23 = vcombine.high %v6190_v15, %v6190_v15  ;;  %v4852_v26 = vcombine.high %v240_v19, %v244_v20  ;;  %v272_v51 = vld [vmem:[#allocation2 + $0x580] sm:$0xff] }
  0x86   :  { %v4851_v32 = vcombine.low %v240_v19, %v244_v20  ;;  %v4853_v33 = vcombine.low %v241_v21, %v245_v53  ;;  %v280_v61 = vld [vmem:[#allocation2 + $0x5c0] sm:$0xff]  ;;  %v301_v19 = vld [vmem:[#allocation2 + $0x668] sm:$0xff] }
  0x87   :  { %v288_v5 = vld [vmem:[#allocation2 + $0x600] sm:$0xff] }
  0x88   :  { %1708 = vmatpush1.bf16.msra.mxu0 %v4787_v28  ;;  %1790 = vmatpush1.bf16.msra.mxu1 %v4789_v29  ;;  %v252_v28 = vld [vmem:[#allocation2 + $0x4e0] sm:$0xff]  ;;  %v249_v29 = vld [vmem:[#allocation2 + $0x4c8] sm:$0xff] }
  0x89   :  { %1709 = vmatprep.subr.bf16.mxu0 %v4796_v30  ;;  %1791 = vmatprep.subr.bf16.mxu1 %v4798_v31  ;;  %v4854_v30 = vcombine.high %v241_v21, %v245_v53  ;;  %v253_v31 = vld [vmem:[#allocation2 + $0x4e8] sm:$0xff]  ;;  %v4860_v34 = vcombine.high %v248_v27, %v252_v28  ;;  %v4859_v40 = vcombine.low %v248_v27, %v252_v28  ;;  %v296_v14 = vld [vmem:[#allocation2 + $0x640] sm:$0xff] }
  0x8a   :  { %v4861_v41 = vcombine.low %v249_v29, %v253_v31  ;;  %v304_v53 = vld [vmem:[#allocation2 + $0x680] sm:$0xff]  ;;  %v309_v27 = vld [vmem:[#allocation2 + $0x6a8] sm:$0xff] }
  0x8c   :  { %1710 = vmatpush1.bf16.msra.mxu0 %v4795_v36  ;;  %1792 = vmatpush1.bf16.msra.mxu1 %v4797_v37  ;;  %v260_v36 = vld [vmem:[#allocation2 + $0x520] sm:$0xff]  ;;  %v257_v37 = vld [vmem:[#allocation2 + $0x508] sm:$0xff] }
  0x8d   :  { %1711 = vmatprep.subr.bf16.mxu0 %v4804_v38  ;;  %1793 = vmatprep.subr.bf16.mxu1 %v4806_v39  ;;  %v4862_v38 = vcombine.high %v249_v29, %v253_v31  ;;  %v261_v39 = vld [vmem:[#allocation2 + $0x528] sm:$0xff]  ;;  %v4868_v42 = vcombine.high %v256_v35, %v260_v36  ;;  %v4867_v48 = vcombine.low %v256_v35, %v260_v36  ;;  %v312_v31 = vld [vmem:[#allocation2 + $0x6c0] sm:$0xff] }
  0x8e   :  { %v4869_v49 = vcombine.low %v257_v37, %v261_v39  ;;  %v317_v35 = vld [vmem:[#allocation2 + $0x6e8] sm:$0xff] }
  0x90   :  { %1712 = vmatpush1.bf16.msra.mxu0 %v4803_v44  ;;  %1794 = vmatpush1.bf16.msra.mxu1 %v4805_v45  ;;  %v268_v44 = vld [vmem:[#allocation2 + $0x560] sm:$0xff]  ;;  %v265_v45 = vld [vmem:[#allocation2 + $0x548] sm:$0xff] }
  0x91   :  { %1713 = vmatprep.subr.bf16.mxu0 %v4812_v46  ;;  %1795 = vmatprep.subr.bf16.mxu1 %v4814_v47  ;;  %v4870_v46 = vcombine.high %v257_v37, %v261_v39  ;;  %v269_v47 = vld [vmem:[#allocation2 + $0x568] sm:$0xff]  ;;  %v4876_v50 = vcombine.high %v264_v43, %v268_v44  ;;  %v4875_v58 = vcombine.low %v264_v43, %v268_v44  ;;  %v320_v39 = vld [vmem:[#allocation2 + $0x700] sm:$0xff] }
  0x92   :  { %v4877_v59 = vcombine.low %v265_v45, %v269_v47  ;;  %v325_v43 = vld [vmem:[#allocation2 + $0x728] sm:$0xff] }
  0x94   :  { %1714 = vmatpush1.bf16.msra.mxu0 %v4811_v52  ;;  %1796 = vmatpush1.bf16.msra.mxu1 %v4813_v54  ;;  %v276_v52 = vld [vmem:[#allocation2 + $0x5a0] sm:$0xff]  ;;  %v273_v54 = vld [vmem:[#allocation2 + $0x588] sm:$0xff] }
  0x95   :  { %1715 = vmatprep.subr.bf16.mxu0 %v4820_v55  ;;  %1797 = vmatprep.subr.bf16.mxu1 %v4822_v56  ;;  %v4878_v55 = vcombine.high %v265_v45, %v269_v47  ;;  %v277_v56 = vld [vmem:[#allocation2 + $0x5a8] sm:$0xff]  ;;  %v4884_v60 = vcombine.high %v272_v51, %v276_v52  ;;  %v4883_v2 = vcombine.low %v272_v51, %v276_v52  ;;  %v328_v47 = vld [vmem:[#allocation2 + $0x740] sm:$0xff] }
  0x96   :  { %v4885_v3 = vcombine.low %v273_v54, %v277_v56  ;;  %v333_v51 = vld [vmem:[#allocation2 + $0x768] sm:$0xff] }
  0x98   :  { %1716 = vmatpush1.bf16.msra.mxu0 %v4819_v62  ;;  %1798 = vmatpush1.bf16.msra.mxu1 %v4821_v63  ;;  %v284_v62 = vld [vmem:[#allocation2 + $0x5e0] sm:$0xff]  ;;  %v281_v63 = vld [vmem:[#allocation2 + $0x5c8] sm:$0xff] }
  0x99   :  { %1717 = vmatprep.subr.bf16.mxu0 %v4828_v0  ;;  %1799 = vmatprep.subr.bf16.mxu1 %v4830_v1  ;;  %v4886_v0 = vcombine.high %v273_v54, %v277_v56  ;;  %v285_v1 = vld [vmem:[#allocation2 + $0x5e8] sm:$0xff]  ;;  %v4892_v4 = vcombine.high %v280_v61, %v284_v62  ;;  %v4891_v10 = vcombine.low %v280_v61, %v284_v62  ;;  %v336_v56 = vld [vmem:[#allocation2 + $0x780] sm:$0xff] }
  0x9a   :  { %v4893_v11 = vcombine.low %v281_v63, %v285_v1  ;;  %v341_v61 = vld [vmem:[#allocation2 + $0x7a8] sm:$0xff] }
  0x9c   :  { %1718 = vmatpush1.bf16.msra.mxu0 %v4827_v6  ;;  %1800 = vmatpush1.bf16.msra.mxu1 %v4829_v7  ;;  %v292_v6 = vld [vmem:[#allocation2 + $0x620] sm:$0xff]  ;;  %v289_v7 = vld [vmem:[#allocation2 + $0x608] sm:$0xff] }
  0x9d   :  { %1728 = vmatprep.subr.bf16.mxu0 %v4836_v8  ;;  %1810 = vmatprep.subr.bf16.mxu1 %v4838_v9  ;;  %v4894_v8 = vcombine.high %v281_v63, %v285_v1  ;;  %v293_v9 = vld [vmem:[#allocation2 + $0x628] sm:$0xff]  ;;  %v4900_v13 = vcombine.high %v288_v5, %v292_v6  ;;  %v4899_v20 = vcombine.low %v288_v5, %v292_v6  ;;  %v344_v1 = vld [vmem:[#allocation2 + $0x7c0] sm:$0xff] }
  0x9e   :  { %v4901_v21 = vcombine.low %v289_v7, %v293_v9  ;;  %v349_v5 = vld [vmem:[#allocation2 + $0x7e8] sm:$0xff] }
  0x9f   :  { %1720 = vmatmul.mubr.bf16.vlgmr.msra.gmra.mrb[0].mxu0 %v6185_v12  ;;  %1802 = vmatmul.mubr.bf16.vlgmr.msra.gmra.mrb[0].mxu1 %v6185_v12 }
  0xa0   :  { %1729 = vmatpush1.bf16.msra.mxu0 %v4835_v16  ;;  %1811 = vmatpush1.bf16.msra.mxu1 %v4837_v17  ;;  %v300_v16 = vld [vmem:[#allocation2 + $0x660] sm:$0xff]  ;;  %v297_v17 = vld [vmem:[#allocation2 + $0x648] sm:$0xff] }
  0xa1   :  { %1730 = vmatprep.subr.bf16.mxu0 %v4844_v18  ;;  %1812 = vmatprep.subr.bf16.mxu1 %v4846_v22  ;;  %v4902_v18 = vcombine.high %v289_v7, %v293_v9  ;;  %v4908_v22 = vcombine.high %v296_v14, %v300_v16  ;;  %v4907_v28 = vcombine.low %v296_v14, %v300_v16  ;;  %v98_v9 = vld [vmem:[#allocation2 + $0x10] sm:$0xff]  ;;  %v103_v14 = vld [vmem:[#allocation2 + $0x38] sm:$0xff] }
  0xa2   :  { %1760 = vmatprep.mubr.bf16.mxu0 %v6194_v23  ;;  %1842 = vmatprep.mubr.bf16.mxu1 %v6194_v23  ;;  %v4909_v29 = vcombine.low %v297_v17, %v301_v19 }
  0xa4   :  { %1731 = vmatpush1.bf16.msra.mxu0 %v4843_v24  ;;  %1813 = vmatpush1.bf16.msra.mxu1 %v4845_v25  ;;  %v308_v24 = vld [vmem:[#allocation2 + $0x6a0] sm:$0xff]  ;;  %v305_v25 = vld [vmem:[#allocation2 + $0x688] sm:$0xff] }
  0xa5   :  { %1732 = vmatprep.subr.bf16.mxu0 %v4852_v26  ;;  %1814 = vmatprep.subr.bf16.mxu1 %v4854_v30  ;;  %v4910_v26 = vcombine.high %v297_v17, %v301_v19  ;;  %v4916_v30 = vcombine.high %v304_v53, %v308_v24  ;;  %v4915_v36 = vcombine.low %v304_v53, %v308_v24  ;;  %v106_v19 = vld [vmem:[#allocation2 + $0x50] sm:$0xff]  ;;  %v111_v53 = vld [vmem:[#allocation2 + $0x78] sm:$0xff] }
  0xa6   :  { %v4917_v37 = vcombine.low %v305_v25, %v309_v27  ;;  %v6202_v24 = vcombine.low %v6190_v15, %v6190_v15 }
  0xa8   :  { %1733 = vmatpush1.bf16.msra.mxu0 %v4851_v32  ;;  %1815 = vmatpush1.bf16.msra.mxu1 %v4853_v33  ;;  %v316_v32 = vld [vmem:[#allocation2 + $0x6e0] sm:$0xff]  ;;  %v313_v33 = vld [vmem:[#allocation2 + $0x6c8] sm:$0xff] }
  0xa9   :  { %1734 = vmatprep.subr.bf16.mxu0 %v4860_v34  ;;  %1816 = vmatprep.subr.bf16.mxu1 %v4862_v38  ;;  %v4918_v34 = vcombine.high %v305_v25, %v309_v27  ;;  %v4924_v38 = vcombine.high %v312_v31, %v316_v32  ;;  %v4923_v44 = vcombine.low %v312_v31, %v316_v32  ;;  %v118_v27 = vld [vmem:[#allocation2 + $0xb0] sm:$0xff]  ;;  %v119_v31 = vld [vmem:[#allocation2 + $0xb8] sm:$0xff] }
  0xaa   :  { %v4925_v45 = vcombine.low %v313_v33, %v317_v35 }
  0xac   :  { %1735 = vmatpush1.bf16.msra.mxu0 %v4859_v40  ;;  %1817 = vmatpush1.bf16.msra.mxu1 %v4861_v41  ;;  %v324_v40 = vld [vmem:[#allocation2 + $0x720] sm:$0xff]  ;;  %v321_v41 = vld [vmem:[#allocation2 + $0x708] sm:$0xff] }
  0xad   :  { %1736 = vmatprep.subr.bf16.mxu0 %v4868_v42  ;;  %1818 = vmatprep.subr.bf16.mxu1 %v4870_v46  ;;  %v4926_v42 = vcombine.high %v313_v33, %v317_v35  ;;  %v4932_v46 = vcombine.high %v320_v39, %v324_v40  ;;  %v4931_v52 = vcombine.low %v320_v39, %v324_v40  ;;  %v122_v35 = vld [vmem:[#allocation2 + $0xd0] sm:$0xff]  ;;  %v127_v39 = vld [vmem:[#allocation2 + $0xf8] sm:$0xff] }
  0xae   :  { %v4933_v54 = vcombine.low %v321_v41, %v325_v43 }
  0xb0   :  { %1737 = vmatpush1.bf16.msra.mxu0 %v4867_v48  ;;  %1819 = vmatpush1.bf16.msra.mxu1 %v4869_v49  ;;  %v332_v48 = vld [vmem:[#allocation2 + $0x760] sm:$0xff]  ;;  %v329_v49 = vld [vmem:[#allocation2 + $0x748] sm:$0xff] }
  0xb1   :  { %1738 = vmatprep.subr.bf16.mxu0 %v4876_v50  ;;  %1820 = vmatprep.subr.bf16.mxu1 %v4878_v55  ;;  %v4934_v50 = vcombine.high %v321_v41, %v325_v43  ;;  %v4940_v55 = vcombine.high %v328_v47, %v332_v48  ;;  %v4939_v62 = vcombine.low %v328_v47, %v332_v48  ;;  %v130_v43 = vld [vmem:[#allocation2 + $0x110] sm:$0xff]  ;;  %v135_v47 = vld [vmem:[#allocation2 + $0x138] sm:$0xff] }
  0xb2   :  { %v4941_v63 = vcombine.low %v329_v49, %v333_v51 }
  0xb4   :  { %1739 = vmatpush1.bf16.msra.mxu0 %v4875_v58  ;;  %1821 = vmatpush1.bf16.msra.mxu1 %v4877_v59  ;;  %v340_v58 = vld [vmem:[#allocation2 + $0x7a0] sm:$0xff]  ;;  %v337_v59 = vld [vmem:[#allocation2 + $0x788] sm:$0xff] }
  0xb5   :  { %1740 = vmatprep.subr.bf16.mxu0 %v4884_v60  ;;  %1822 = vmatprep.subr.bf16.mxu1 %v4886_v0  ;;  %v4942_v60 = vcombine.high %v329_v49, %v333_v51  ;;  %v4948_v0 = vcombine.high %v336_v56, %v340_v58  ;;  %v4947_v6 = vcombine.low %v336_v56, %v340_v58  ;;  %v138_v51 = vld [vmem:[#allocation2 + $0x150] sm:$0xff] }
  0xb6   :  { %v4949_v7 = vcombine.low %v337_v59, %v341_v61 }
  0xb8   :  { %1741 = vmatpush1.bf16.msra.mxu0 %v4883_v2  ;;  %1823 = vmatpush1.bf16.msra.mxu1 %v4885_v3  ;;  %v348_v2 = vld [vmem:[#allocation2 + $0x7e0] sm:$0xff]  ;;  %v345_v3 = vld [vmem:[#allocation2 + $0x7c8] sm:$0xff] }
  0xb9   :  { %1742 = vmatprep.subr.bf16.mxu0 %v4892_v4  ;;  %1824 = vmatprep.subr.bf16.mxu1 %v4894_v8  ;;  %v4950_v4 = vcombine.high %v337_v59, %v341_v61  ;;  %v4956_v8 = vcombine.high %v344_v1, %v348_v2  ;;  %v4955_v16 = vcombine.low %v344_v1, %v348_v2  ;;  %v150_v61 = vld [vmem:[#allocation2 + $0x1b0] sm:$0xff] }
  0xba   :  { %v4957_v17 = vcombine.low %v345_v3, %v349_v5 }
  0xbc   :  { %1743 = vmatpush1.bf16.msra.mxu0 %v4891_v10  ;;  %1825 = vmatpush1.bf16.msra.mxu1 %v4893_v11  ;;  %v102_v10 = vld [vmem:[#allocation2 + $0x30] sm:$0xff]  ;;  %v99_v11 = vld [vmem:[#allocation2 + $0x18] sm:$0xff] }
  0xbd   :  { %1744 = vmatprep.subr.bf16.mxu0 %v4900_v13  ;;  %1826 = vmatprep.subr.bf16.mxu1 %v4902_v18  ;;  %v4958_v13 = vcombine.high %v345_v3, %v349_v5  ;;  %v4712_v18 = vcombine.high %v98_v9, %v102_v10  ;;  %v4711_v25 = vcombine.low %v98_v9, %v102_v10  ;;  %v158_v5 = vld [vmem:[#allocation2 + $0x1f0] sm:$0xff] }
  0xc0   :  { %1745 = vmatpush1.bf16.msra.mxu0 %v4899_v20  ;;  %1827 = vmatpush1.bf16.msra.mxu1 %v4901_v21  ;;  %v110_v20 = vld [vmem:[#allocation2 + $0x70] sm:$0xff]  ;;  %v107_v21 = vld [vmem:[#allocation2 + $0x58] sm:$0xff] }
  0xc1   :  { %1746 = vmatprep.subr.bf16.mxu0 %v4908_v22  ;;  %1828 = vmatprep.subr.bf16.mxu1 %v4910_v26  ;;  %v4714_v22 = vcombine.high %v99_v11, %v103_v14  ;;  %v114_v26 = vld [vmem:[#allocation2 + $0x90] sm:$0xff]  ;;  %v4722_v32 = vcombine.high %v107_v21, %v111_v53  ;;  %v4719_v33 = vcombine.low %v106_v19, %v110_v20 }
  0xc2   :  { %v4721_v15 = vcombine.low %v107_v21, %v111_v53  ;;  %v4727_v40 = vcombine.low %v114_v26, %v118_v27  ;;  %v174_v53 = vld [vmem:[#allocation2 + $0x270] sm:$0xff] }
  0xc4   :  { %1747 = vmatpush1.bf16.msra.mxu0 %v4907_v28  ;;  %1829 = vmatpush1.bf16.msra.mxu1 %v4909_v29  ;;  %v4713_v28 = vcombine.low %v99_v11, %v103_v14  ;;  %v4720_v29 = vcombine.high %v106_v19, %v110_v20  ;;  %v166_v14 = vld [vmem:[#allocation2 + $0x230] sm:$0xff] }
  0xc5   :  { %1748 = vmatprep.subr.bf16.mxu0 %v4916_v30  ;;  %1830 = vmatprep.subr.bf16.mxu1 %v4918_v34  ;;  %v115_v30 = vld [vmem:[#allocation2 + $0x98] sm:$0xff]  ;;  %v4728_v34 = vcombine.high %v114_v26, %v118_v27 }
  0xc6   :  { %v4729_v41 = vcombine.low %v115_v30, %v119_v31  ;;  %v175_v27 = vld [vmem:[#allocation2 + $0x278] sm:$0xff] }
  0xc8   :  { %1749 = vmatpush1.bf16.msra.mxu0 %v4915_v36  ;;  %1831 = vmatpush1.bf16.msra.mxu1 %v4917_v37  ;;  %v126_v36 = vld [vmem:[#allocation2 + $0xf0] sm:$0xff]  ;;  %v4730_v37 = vcombine.high %v115_v30, %v119_v31 }
  0xc9   :  { %1750 = vmatprep.subr.bf16.mxu0 %v4924_v38  ;;  %1832 = vmatprep.subr.bf16.mxu1 %v4926_v42  ;;  %v123_v38 = vld [vmem:[#allocation2 + $0xd8] sm:$0xff]  ;;  %v4736_v42 = vcombine.high %v122_v35, %v126_v36  ;;  %v4735_v48 = vcombine.low %v122_v35, %v126_v36  ;;  %v178_v31 = vld [vmem:[#allocation2 + $0x290] sm:$0xff] }
  0xca   :  { %v4737_v49 = vcombine.low %v123_v38, %v127_v39 }
  0xcc   :  { %1751 = vmatpush1.bf16.msra.mxu0 %v4923_v44  ;;  %1833 = vmatpush1.bf16.msra.mxu1 %v4925_v45  ;;  %v134_v44 = vld [vmem:[#allocation2 + $0x130] sm:$0xff]  ;;  %v131_v45 = vld [vmem:[#allocation2 + $0x118] sm:$0xff] }
  0xcd   :  { %1752 = vmatprep.subr.bf16.mxu0 %v4932_v46  ;;  %1834 = vmatprep.subr.bf16.mxu1 %v4934_v50  ;;  %v4738_v46 = vcombine.high %v123_v38, %v127_v39  ;;  %v4744_v50 = vcombine.high %v130_v43, %v134_v44  ;;  %v4743_v56 = vcombine.low %v130_v43, %v134_v44  ;;  %v186_v38 = vld [vmem:[#allocation2 + $0x2d0] sm:$0xff] }
  0xce   :  { %v4745_v58 = vcombine.low %v131_v45, %v135_v47  ;;  %v190_v39 = vld [vmem:[#allocation2 + $0x2f0] sm:$0xff] }
  0xd0   :  { %1753 = vmatpush1.bf16.msra.mxu0 %v4931_v52  ;;  %1835 = vmatpush1.bf16.msra.mxu1 %v4933_v54  ;;  %v139_v52 = vld [vmem:[#allocation2 + $0x158] sm:$0xff]  ;;  %v4746_v54 = vcombine.high %v131_v45, %v135_v47  ;;  %v4800_v45 = vcombine.high %v186_v38, %v190_v39  ;;  %v198_v47 = vld [vmem:[#allocation2 + $0x330] sm:$0xff] }
  0xd1   :  { %1754 = vmatprep.subr.bf16.mxu0 %v4940_v55  ;;  %1836 = vmatprep.subr.bf16.mxu1 %v4942_v60  ;;  %v143_v55 = vld [vmem:[#allocation2 + $0x178] sm:$0xff]  ;;  %v146_v60 = vld [vmem:[#allocation2 + $0x190] sm:$0xff] }
  0xd2   :  { %v4753_v2 = vcombine.low %v139_v52, %v143_v55  ;;  %v4760_v3 = vcombine.high %v146_v60, %v150_v61  ;;  %v4759_v9 = vcombine.low %v146_v60, %v150_v61 }
  0xd4   :  { %1755 = vmatpush1.bf16.msra.mxu0 %v4939_v62  ;;  %1837 = vmatpush1.bf16.msra.mxu1 %v4941_v63  ;;  %v147_v62 = vld [vmem:[#allocation2 + $0x198] sm:$0xff]  ;;  %v4754_v63 = vcombine.high %v139_v52, %v143_v55  ;;  %v206_v55 = vld [vmem:[#allocation2 + $0x370] sm:$0xff] }
  0xd5   :  { %1756 = vmatprep.subr.bf16.mxu0 %v4948_v0  ;;  %1838 = vmatprep.subr.bf16.mxu1 %v4950_v4  ;;  %v151_v0 = vld [vmem:[#allocation2 + $0x1b8] sm:$0xff]  ;;  %v154_v4 = vld [vmem:[#allocation2 + $0x1d0] sm:$0xff] }
  0xd6   :  { %v4761_v10 = vcombine.low %v147_v62, %v151_v0  ;;  %v4768_v11 = vcombine.high %v154_v4, %v158_v5  ;;  %v4767_v19 = vcombine.low %v154_v4, %v158_v5 }
  0xd8   :  { %1757 = vmatpush1.bf16.msra.mxu0 %v4947_v6  ;;  %1839 = vmatpush1.bf16.msra.mxu1 %v4949_v7  ;;  %v155_v6 = vld [vmem:[#allocation2 + $0x1d8] sm:$0xff]  ;;  %v4762_v7 = vcombine.high %v147_v62, %v151_v0  ;;  %v214_v0 = vld [vmem:[#allocation2 + $0x3b0] sm:$0xff] }
  0xd9   :  { %1758 = vmatprep.subr.bf16.mxu0 %v4956_v8  ;;  %1840 = vmatprep.subr.bf16.mxu1 %v4958_v13  ;;  %v159_v8 = vld [vmem:[#allocation2 + $0x1f8] sm:$0xff]  ;;  %v162_v13 = vld [vmem:[#allocation2 + $0x210] sm:$0xff] }
  0xda   :  { %v4769_v20 = vcombine.low %v155_v6, %v159_v8  ;;  %v4776_v21 = vcombine.high %v162_v13, %v166_v14 }
  0xdc   :  { %1759 = vmatpush1.bf16.msra.mxu0 %v4955_v16  ;;  %1841 = vmatpush1.bf16.msra.mxu1 %v4957_v17  ;;  %v163_v16 = vld [vmem:[#allocation2 + $0x218] sm:$0xff]  ;;  %v4770_v17 = vcombine.high %v155_v6, %v159_v8  ;;  %v222_v8 = vld [vmem:[#allocation2 + $0x3f0] sm:$0xff] }
  0xdd   :  { %1851 = vmatprep.subr.bf16.mxu0 %v4712_v18  ;;  %1933 = vmatprep.subr.bf16.mxu1 %v4714_v22  ;;  %v167_v18 = vld [vmem:[#allocation2 + $0x238] sm:$0xff]  ;;  %v170_v22 = vld [vmem:[#allocation2 + $0x250] sm:$0xff] }
  0xde   :  { %v4778_v26 = vcombine.high %v163_v16, %v167_v18  ;;  %v4784_v30 = vcombine.high %v170_v22, %v174_v53  ;;  %v4783_v35 = vcombine.low %v170_v22, %v174_v53  ;;  %v234_v53 = vld [vmem:[#allocation2 + $0x450] sm:$0xff] }
  0xdf   :  { %1761 = vmatmul.mubr.bf16.vlgmr.msra.gmra.mrb[0].mxu0 %v6202_v24  ;;  %1843 = vmatmul.mubr.bf16.vlgmr.msra.gmra.mrb[0].mxu1 %v6202_v24 }
  0xe0   :  { %1852 = vmatpush1.bf16.msra.mxu0 %v4711_v25  ;;  %1934 = vmatpush1.bf16.msra.mxu1 %v4713_v28  ;;  %v171_v25 = vld [vmem:[#allocation2 + $0x258] sm:$0xff]  ;;  %v4775_v28 = vcombine.low %v162_v13, %v166_v14  ;;  %v226_v14 = vld [vmem:[#allocation2 + $0x410] sm:$0xff] }
  0xe1   :  { %1853 = vmatprep.subr.bf16.mxu0 %v4720_v29  ;;  %1935 = vmatprep.subr.bf16.mxu1 %v4722_v32  ;;  %v4777_v29 = vcombine.low %v163_v16, %v167_v18  ;;  %v182_v32 = vld [vmem:[#allocation2 + $0x2b0] sm:$0xff]  ;;  %v4785_v36 = vcombine.low %v171_v25, %v175_v27 }
  0xe2   :  { %1883 = vmatprep.mubr.bf16.mxu0 %v6179_v57  ;;  %1965 = vmatprep.mubr.bf16.mxu1 %v6179_v57  ;;  %v142_v57 = vld [vmem:[#allocation2 + $0x170] sm:$0xff]  ;;  %v4791_v43 = vcombine.low %v178_v31, %v182_v32 }
  0xe3   :  { %v4752_v59 = vcombine.high %v138_v51, %v142_v57  ;;  %v4751_v1 = vcombine.low %v138_v51, %v142_v57  ;;  %v4799_v51 = vcombine.low %v186_v38, %v190_v39  ;;  %v230_v16 = vld [vmem:[#allocation2 + $0x430] sm:$0xff] }
  0xe4   :  { %1854 = vmatpush1.bf16.msra.mxu0 %v4719_v33  ;;  %1936 = vmatpush1.bf16.msra.mxu1 %v4721_v15  ;;  %v179_v33 = vld [vmem:[#allocation2 + $0x298] sm:$0xff]  ;;  %v4786_v15 = vcombine.high %v171_v25, %v175_v27  ;;  %v238_v25 = vld [vmem:[#allocation2 + $0x470] sm:$0xff]  ;;  %v4840_v27 = vcombine.high %v226_v14, %v230_v16 }
  0xe5   :  { %1855 = vmatprep.subr.bf16.mxu0 %v4728_v34  ;;  %1937 = vmatprep.subr.bf16.mxu1 %v4730_v37  ;;  %v183_v34 = vld [vmem:[#allocation2 + $0x2b8] sm:$0xff]  ;;  %v4792_v37 = vcombine.high %v178_v31, %v182_v32  ;;  %v4839_v31 = vcombine.low %v226_v14, %v230_v16  ;;  %v242_v32 = vld [vmem:[#allocation2 + $0x490] sm:$0xff]  ;;  %v4847_v38 = vcombine.low %v234_v53, %v238_v25 }
  0xe6   :  { %v4793_v44 = vcombine.low %v179_v33, %v183_v34  ;;  %v250_v39 = vld [vmem:[#allocation2 + $0x4d0] sm:$0xff] }
  0xe8   :  { %1856 = vmatpush1.bf16.msra.mxu0 %v4727_v40  ;;  %1938 = vmatpush1.bf16.msra.mxu1 %v4729_v41  ;;  %v187_v40 = vld [vmem:[#allocation2 + $0x2d8] sm:$0xff]  ;;  %v4794_v41 = vcombine.high %v179_v33, %v183_v34  ;;  %v246_v33 = vld [vmem:[#allocation2 + $0x4b0] sm:$0xff]  ;;  %v4848_v34 = vcombine.high %v234_v53, %v238_v25 }
  0xe9   :  { %1857 = vmatprep.subr.bf16.mxu0 %v4736_v42  ;;  %1939 = vmatprep.subr.bf16.mxu1 %v4738_v46  ;;  %v191_v42 = vld [vmem:[#allocation2 + $0x2f8] sm:$0xff]  ;;  %v194_v46 = vld [vmem:[#allocation2 + $0x310] sm:$0xff] }
  0xea   :  { %v4801_v57 = vcombine.low %v187_v40, %v191_v42  ;;  %v4808_v52 = vcombine.high %v194_v46, %v198_v47  ;;  %v4807_v60 = vcombine.low %v194_v46, %v198_v47  ;;  %v4855_v46 = vcombine.low %v242_v32, %v246_v33  ;;  %v258_v47 = vld [vmem:[#allocation2 + $0x510] sm:$0xff] }
  0xec   :  { %1858 = vmatpush1.bf16.msra.mxu0 %v4735_v48  ;;  %1940 = vmatpush1.bf16.msra.mxu1 %v4737_v49  ;;  %v195_v48 = vld [vmem:[#allocation2 + $0x318] sm:$0xff]  ;;  %v4802_v49 = vcombine.high %v187_v40, %v191_v42  ;;  %v254_v40 = vld [vmem:[#allocation2 + $0x4f0] sm:$0xff]  ;;  %v4856_v42 = vcombine.high %v242_v32, %v246_v33 }
  0xed   :  { %1859 = vmatprep.subr.bf16.mxu0 %v4744_v50  ;;  %1941 = vmatprep.subr.bf16.mxu1 %v4746_v54  ;;  %v199_v50 = vld [vmem:[#allocation2 + $0x338] sm:$0xff]  ;;  %v202_v54 = vld [vmem:[#allocation2 + $0x350] sm:$0xff] }
  0xee   :  { %v4809_v61 = vcombine.low %v195_v48, %v199_v50  ;;  %v4816_v62 = vcombine.high %v202_v54, %v206_v55  ;;  %v4815_v4 = vcombine.low %v202_v54, %v206_v55  ;;  %v266_v54 = vld [vmem:[#allocation2 + $0x550] sm:$0xff] }
  0xef   :  { %v270_v55 = vld [vmem:[#allocation2 + $0x570] sm:$0xff] }
  0xf0   :  { %1860 = vmatpush1.bf16.msra.mxu0 %v4743_v56  ;;  %1942 = vmatpush1.bf16.msra.mxu1 %v4745_v58  ;;  %v203_v56 = vld [vmem:[#allocation2 + $0x358] sm:$0xff]  ;;  %v4810_v58 = vcombine.high %v195_v48, %v199_v50  ;;  %v262_v48 = vld [vmem:[#allocation2 + $0x530] sm:$0xff] }
  0xf1   :  { %1861 = vmatprep.subr.bf16.mxu0 %v4752_v59  ;;  %1943 = vmatprep.subr.bf16.mxu1 %v4754_v63  ;;  %v207_v59 = vld [vmem:[#allocation2 + $0x378] sm:$0xff]  ;;  %v210_v63 = vld [vmem:[#allocation2 + $0x390] sm:$0xff] }
  0xf2   :  { %v4817_v5 = vcombine.low %v203_v56, %v207_v59  ;;  %v4824_v6 = vcombine.high %v210_v63, %v214_v0  ;;  %v4823_v13 = vcombine.low %v210_v63, %v214_v0  ;;  %v259_v50 = vld [vmem:[#allocation2 + $0x518] sm:$0xff]  ;;  %v278_v63 = vld [vmem:[#allocation2 + $0x5b0] sm:$0xff] }
  0xf4   :  { %1862 = vmatpush1.bf16.msra.mxu0 %v4751_v1  ;;  %1944 = vmatpush1.bf16.msra.mxu1 %v4753_v2  ;;  %v211_v1 = vld [vmem:[#allocation2 + $0x398] sm:$0xff]  ;;  %v4818_v2 = vcombine.high %v203_v56, %v207_v59 }
  0xf5   :  { %1863 = vmatprep.subr.bf16.mxu0 %v4760_v3  ;;  %1945 = vmatprep.subr.bf16.mxu1 %v4762_v7  ;;  %v215_v3 = vld [vmem:[#allocation2 + $0x3b8] sm:$0xff]  ;;  %v218_v7 = vld [vmem:[#allocation2 + $0x3d0] sm:$0xff] }
  0xf6   :  { %v4832_v18 = vcombine.high %v218_v7, %v222_v8  ;;  %v4831_v22 = vcombine.low %v218_v7, %v222_v8  ;;  %v271_v59 = vld [vmem:[#allocation2 + $0x578] sm:$0xff]  ;;  %v282_v8 = vld [vmem:[#allocation2 + $0x5d0] sm:$0xff] }
  0xf8   :  { %1864 = vmatpush1.bf16.msra.mxu0 %v4759_v9  ;;  %1946 = vmatpush1.bf16.msra.mxu1 %v4761_v10  ;;  %v219_v9 = vld [vmem:[#allocation2 + $0x3d8] sm:$0xff]  ;;  %v4826_v10 = vcombine.high %v211_v1, %v215_v3 }
  0xf9   :  { %1865 = vmatprep.subr.bf16.mxu0 %v4768_v11  ;;  %1947 = vmatprep.subr.bf16.mxu1 %v4770_v17  ;;  %v223_v11 = vld [vmem:[#allocation2 + $0x3f8] sm:$0xff]  ;;  %v4825_v17 = vcombine.low %v211_v1, %v215_v3  ;;  %v4880_v1 = vcombine.high %v266_v54, %v270_v55 }
  0xfa   :  { %v279_v3 = vld [vmem:[#allocation2 + $0x5b8] sm:$0xff] }
  0xfc   :  { %1866 = vmatpush1.bf16.msra.mxu0 %v4767_v19  ;;  %1948 = vmatpush1.bf16.msra.mxu1 %v4769_v20  ;;  %v227_v19 = vld [vmem:[#allocation2 + $0x418] sm:$0xff] }
  0xfd   :  { %1867 = vmatprep.subr.bf16.mxu0 %v4776_v21  ;;  %1949 = vmatprep.subr.bf16.mxu1 %v4778_v26  ;;  %v231_v20 = vld [vmem:[#allocation2 + $0x438] sm:$0xff]  ;;  %v4834_v21 = vcombine.high %v219_v9, %v223_v11  ;;  %v4833_v26 = vcombine.low %v219_v9, %v223_v11  ;;  %v286_v9 = vld [vmem:[#allocation2 + $0x5f0] sm:$0xff] }
  0xfe   :  { %v283_v11 = vld [vmem:[#allocation2 + $0x5d8] sm:$0xff]  ;;  %v4895_v53 = vcombine.low %v282_v8, %v286_v9 }
 0x100   :  { %1868 = vmatpush1.bf16.msra.mxu0 %v4775_v28  ;;  %1950 = vmatpush1.bf16.msra.mxu1 %v4777_v29  ;;  %v235_v28 = vld [vmem:[#allocation2 + $0x458] sm:$0xff] }
 0x101   :  { %1869 = vmatprep.subr.bf16.mxu0 %v4784_v30  ;;  %1951 = vmatprep.subr.bf16.mxu1 %v4786_v15  ;;  %v239_v29 = vld [vmem:[#allocation2 + $0x478] sm:$0xff]  ;;  %v4842_v30 = vcombine.high %v227_v19, %v231_v20  ;;  %v4841_v15 = vcombine.low %v227_v19, %v231_v20  ;;  %v294_v19 = vld [vmem:[#allocation2 + $0x630] sm:$0xff] }
 0x104   :  { %1870 = vmatpush1.bf16.msra.mxu0 %v4783_v35  ;;  %1952 = vmatpush1.bf16.msra.mxu1 %v4785_v36  ;;  %v243_v35 = vld [vmem:[#allocation2 + $0x498] sm:$0xff] }
 0x105   :  { %1871 = vmatprep.subr.bf16.mxu0 %v4792_v37  ;;  %1953 = vmatprep.subr.bf16.mxu1 %v4794_v41  ;;  %v247_v36 = vld [vmem:[#allocation2 + $0x4b8] sm:$0xff]  ;;  %v4850_v37 = vcombine.high %v235_v28, %v239_v29  ;;  %v4849_v41 = vcombine.low %v235_v28, %v239_v29  ;;  %v302_v28 = vld [vmem:[#allocation2 + $0x670] sm:$0xff] }
 0x108   :  { %1872 = vmatpush1.bf16.msra.mxu0 %v4791_v43  ;;  %1954 = vmatpush1.bf16.msra.mxu1 %v4793_v44  ;;  %v251_v43 = vld [vmem:[#allocation2 + $0x4d8] sm:$0xff] }
 0x109   :  { %1873 = vmatprep.subr.bf16.mxu0 %v4800_v45  ;;  %1955 = vmatprep.subr.bf16.mxu1 %v4802_v49  ;;  %v255_v44 = vld [vmem:[#allocation2 + $0x4f8] sm:$0xff]  ;;  %v4858_v45 = vcombine.high %v243_v35, %v247_v36  ;;  %v4864_v49 = vcombine.high %v250_v39, %v254_v40 }
 0x10a   :  { %v4865_v56 = vcombine.low %v251_v43, %v255_v44 }
 0x10c   :  { %1874 = vmatpush1.bf16.msra.mxu0 %v4799_v51  ;;  %1956 = vmatpush1.bf16.msra.mxu1 %v4801_v57  ;;  %v263_v51 = vld [vmem:[#allocation2 + $0x538] sm:$0xff]  ;;  %v4866_v57 = vcombine.high %v251_v43, %v255_v44 }
 0x10d   :  { %1875 = vmatprep.subr.bf16.mxu0 %v4808_v52  ;;  %1957 = vmatprep.subr.bf16.mxu1 %v4810_v58  ;;  %v4863_v52 = vcombine.low %v250_v39, %v254_v40  ;;  %v267_v58 = vld [vmem:[#allocation2 + $0x558] sm:$0xff]  ;;  %v4873_v0 = vcombine.low %v259_v50, %v263_v51  ;;  %v314_v40 = vld [vmem:[#allocation2 + $0x6d0] sm:$0xff] }
 0x10e   :  { %v315_v44 = vld [vmem:[#allocation2 + $0x6d8] sm:$0xff] }
 0x110   :  { %1876 = vmatpush1.bf16.msra.mxu0 %v4807_v60  ;;  %1958 = vmatpush1.bf16.msra.mxu1 %v4809_v61  ;;  %v4874_v60 = vcombine.high %v259_v50, %v263_v51  ;;  %v4871_v61 = vcombine.low %v258_v47, %v262_v48  ;;  %v323_v51 = vld [vmem:[#allocation2 + $0x718] sm:$0xff] }
 0x111   :  { %1877 = vmatprep.subr.bf16.mxu0 %v4816_v62  ;;  %1959 = vmatprep.subr.bf16.mxu1 %v4818_v2  ;;  %v274_v62 = vld [vmem:[#allocation2 + $0x590] sm:$0xff]  ;;  %v275_v2 = vld [vmem:[#allocation2 + $0x598] sm:$0xff] }
 0x112   :  { %v4888_v7 = vcombine.high %v274_v62, %v278_v63  ;;  %v4887_v14 = vcombine.low %v274_v62, %v278_v63  ;;  %v4889_v16 = vcombine.low %v275_v2, %v279_v3 }
 0x114   :  { %1878 = vmatpush1.bf16.msra.mxu0 %v4815_v4  ;;  %1960 = vmatpush1.bf16.msra.mxu1 %v4817_v5  ;;  %v4882_v4 = vcombine.high %v267_v58, %v271_v59  ;;  %v4879_v5 = vcombine.low %v266_v54, %v270_v55 }
 0x115   :  { %1879 = vmatprep.subr.bf16.mxu0 %v4824_v6  ;;  %1961 = vmatprep.subr.bf16.mxu1 %v4826_v10  ;;  %v4881_v6 = vcombine.low %v267_v58, %v271_v59  ;;  %v4890_v10 = vcombine.high %v275_v2, %v279_v3  ;;  %v330_v58 = vld [vmem:[#allocation2 + $0x750] sm:$0xff] }
 0x116   :  { %v334_v59 = vld [vmem:[#allocation2 + $0x770] sm:$0xff] }
 0x117   :  { %v338_v2 = vld [vmem:[#allocation2 + $0x790] sm:$0xff] }
 0x118   :  { %1880 = vmatpush1.bf16.msra.mxu0 %v4823_v13  ;;  %1962 = vmatpush1.bf16.msra.mxu1 %v4825_v17  ;;  %v287_v13 = vld [vmem:[#allocation2 + $0x5f8] sm:$0xff]  ;;  %v4896_v17 = vcombine.high %v282_v8, %v286_v9  ;;  %v342_v3 = vld [vmem:[#allocation2 + $0x7b0] sm:$0xff] }
 0x119   :  { %1881 = vmatprep.subr.bf16.mxu0 %v4832_v18  ;;  %1963 = vmatprep.subr.bf16.mxu1 %v4834_v21  ;;  %v290_v18 = vld [vmem:[#allocation2 + $0x610] sm:$0xff]  ;;  %v4898_v20 = vcombine.high %v283_v11, %v287_v13  ;;  %v291_v21 = vld [vmem:[#allocation2 + $0x618] sm:$0xff]  ;;  %v4897_v25 = vcombine.low %v283_v11, %v287_v13  ;;  %v4952_v8 = vcombine.high %v338_v2, %v342_v3 }
 0x11a   :  { %v4903_v32 = vcombine.low %v290_v18, %v294_v19  ;;  %v350_v11 = vld [vmem:[#allocation2 + $0x7f0] sm:$0xff]  ;;  %v347_v13 = vld [vmem:[#allocation2 + $0x7d8] sm:$0xff] }
 0x11c   :  { %1882 = vmatpush1.bf16.msra.mxu0 %v4831_v22  ;;  %1964 = vmatpush1.bf16.msra.mxu1 %v4833_v26  ;;  %v295_v22 = vld [vmem:[#allocation2 + $0x638] sm:$0xff]  ;;  %v4904_v26 = vcombine.high %v290_v18, %v294_v19 }
 0x11d   :  { %1892 = vmatprep.subr.bf16.mxu0 %v4840_v27  ;;  %1974 = vmatprep.subr.bf16.mxu1 %v4842_v30  ;;  %v298_v27 = vld [vmem:[#allocation2 + $0x650] sm:$0xff]  ;;  %v4906_v29 = vcombine.high %v291_v21, %v295_v22  ;;  %v299_v30 = vld [vmem:[#allocation2 + $0x658] sm:$0xff]  ;;  %v4905_v33 = vcombine.low %v291_v21, %v295_v22 }
 0x11e   :  { %v4911_v39 = vcombine.low %v298_v27, %v302_v28  ;;  %v5439_v22 = vld [vmem:[#allocation4 + $0x4] ss:$16 sps:$4 sm:$0xff]  }
 0x11f   :  { %1884 = vmatmul.mubr.bf16.vlgmr.msra.gmra.mrb[4].mxu0 %v6185_v12  ;;  %1966 = vmatmul.mubr.bf16.vlgmr.msra.gmra.mrb[4].mxu1 %v6185_v12  ;;  %v4857_v12 = vcombine.low %v243_v35, %v247_v36  ;;  %v310_v35 = vld [vmem:[#allocation2 + $0x6b0] sm:$0xff]  ;;  %v307_v36 = vld [vmem:[#allocation2 + $0x698] sm:$0xff] }
 0x120   :  { %1893 = vmatpush1.bf16.msra.mxu0 %v4839_v31  ;;  %1975 = vmatpush1.bf16.msra.mxu1 %v4841_v15  ;;  %v303_v31 = vld [vmem:[#allocation2 + $0x678] sm:$0xff]  ;;  %v4912_v15 = vcombine.high %v298_v27, %v302_v28  ;;  %v5445_v27 = vld [vmem:[#allocation4 + $0x24] ss:$16 sps:$4 sm:$0xff]  }
 0x121   :  { %1894 = vmatprep.subr.bf16.mxu0 %v4848_v34  ;;  %1976 = vmatprep.subr.bf16.mxu1 %v4850_v37  ;;  %v306_v34 = vld [vmem:[#allocation2 + $0x690] sm:$0xff]  ;;  %v4914_v37 = vcombine.high %v299_v30, %v303_v31  ;;  %v5448_v28 = vld [vmem:[#allocation4 + $0x2c] ss:$16 sps:$4 sm:$0xff]  }
 0x122   :  { %1924 = vmatprep.mubr.bf16.mxu0 %v6194_v23  ;;  %2006 = vmatprep.mubr.bf16.mxu1 %v6194_v23  ;;  %v4872_v23 = vcombine.high %v258_v47, %v262_v48  ;;  %v4920_v43 = vcombine.high %v306_v34, %v310_v35  ;;  %v4919_v47 = vcombine.low %v306_v34, %v310_v35  ;;  %v322_v48 = vld [vmem:[#allocation2 + $0x710] sm:$0xff]  ;;  %v5460_v35 = vld [vmem:[#allocation4 + $0x6c] ss:$16 sps:$4 sm:$0xff]  }
 0x123   :  { %v5457_v34 = vld [vmem:[#allocation4 + $0x64] ss:$16 sps:$4 sm:$0xff]  }
 0x124   :  { %1895 = vmatpush1.bf16.msra.mxu0 %v4847_v38  ;;  %1977 = vmatpush1.bf16.msra.mxu1 %v4849_v41  ;;  %v311_v38 = vld [vmem:[#allocation2 + $0x6b8] sm:$0xff]  ;;  %v318_v41 = vld [vmem:[#allocation2 + $0x6f0] sm:$0xff] }
 0x125   :  { %1896 = vmatprep.subr.bf16.mxu0 %v4856_v42  ;;  %1978 = vmatprep.subr.bf16.mxu1 %v4858_v45  ;;  %v4913_v42 = vcombine.low %v299_v30, %v303_v31  ;;  %v319_v45 = vld [vmem:[#allocation2 + $0x6f8] sm:$0xff]  ;;  %v4928_v50 = vcombine.high %v314_v40, %v318_v41  ;;  %v4927_v54 = vcombine.low %v314_v40, %v318_v41  ;;  %v5451_v31 = vld [vmem:[#allocation4 + $0x44] ss:$16 sps:$4 sm:$0xff]  }
 0x126   :  { %v4929_v55 = vcombine.low %v315_v44, %v319_v45  ;;  %v5446_v30 = vld [vmem:[#allocation4 + $0x28] ss:$16 sps:$4 sm:$0xff]   ;;  %v5469_v41 = vld [vmem:[#allocation4 + $0xa4] ss:$16 sps:$4 sm:$0xff]  }
 0x127   :  { %v5464_v40 = vld [vmem:[#allocation4 + $0x88] ss:$16 sps:$4 sm:$0xff]  }
 0x128   :  { %1897 = vmatpush1.bf16.msra.mxu0 %v4855_v46  ;;  %1979 = vmatpush1.bf16.msra.mxu1 %v4857_v12  ;;  %v4922_v46 = vcombine.high %v307_v36, %v311_v38  ;;  %v326_v12 = vld [vmem:[#allocation2 + $0x730] sm:$0xff] }
 0x129   :  { %1898 = vmatprep.subr.bf16.mxu0 %v4864_v49  ;;  %1980 = vmatprep.subr.bf16.mxu1 %v4866_v57  ;;  %v4921_v49 = vcombine.low %v307_v36, %v311_v38  ;;  %v327_v57 = vld [vmem:[#allocation2 + $0x738] sm:$0xff]  ;;  %v4935_v62 = vcombine.low %v322_v48, %v326_v12  ;;  %v5455_v36 = vld [vmem:[#allocation4 + $0x60] ss:$16 sps:$4 sm:$0xff]  }
 0x12a   :  { %v4937_v63 = vcombine.low %v323_v51, %v327_v57  ;;  %v5466_v38 = vld [vmem:[#allocation4 + $0x8c] ss:$16 sps:$4 sm:$0xff]  }
 0x12c   :  { %1899 = vmatpush1.bf16.msra.mxu0 %v4863_v52  ;;  %1981 = vmatpush1.bf16.msra.mxu1 %v4865_v56  ;;  %v4930_v52 = vcombine.high %v315_v44, %v319_v45  ;;  %v4936_v56 = vcombine.high %v322_v48, %v326_v12  ;;  %v5470_v44 = vld [vmem:[#allocation4 + $0xa8] ss:$16 sps:$4 sm:$0xff]   ;;  %v5475_v45 = vld [vmem:[#allocation4 + $0xc4] ss:$16 sps:$4 sm:$0xff]  }
 0x12d   :  { %1900 = vmatprep.subr.bf16.mxu0 %v4872_v23  ;;  %1982 = vmatprep.subr.bf16.mxu1 %v4874_v60  ;;  %v4938_v23 = vcombine.high %v323_v51, %v327_v57  ;;  %v331_v60 = vld [vmem:[#allocation2 + $0x758] sm:$0xff]  ;;  %v5481_v12 = vld [vmem:[#allocation4 + $0xe4] ss:$16 sps:$4 sm:$0xff]  }
 0x12e   :  { %v5476_v48 = vld [vmem:[#allocation4 + $0xc8] ss:$16 sps:$4 sm:$0xff]   ;;  %v5487_v57 = vld [vmem:[#allocation4 + $0x104] ss:$16 sps:$4 sm:$0xff]  }
 0x12f   :  { %v5482_v51 = vld [vmem:[#allocation4 + $0xe8] ss:$16 sps:$4 sm:$0xff]  }
 0x130   :  { %1901 = vmatpush1.bf16.msra.mxu0 %v4871_v61  ;;  %1983 = vmatpush1.bf16.msra.mxu1 %v4873_v0  ;;  %v335_v61 = vld [vmem:[#allocation2 + $0x778] sm:$0xff]  ;;  %v4944_v0 = vcombine.high %v330_v58, %v334_v59 }
 0x131   :  { %1902 = vmatprep.subr.bf16.mxu0 %v4880_v1  ;;  %1984 = vmatprep.subr.bf16.mxu1 %v4882_v4  ;;  %v4946_v1 = vcombine.high %v331_v60, %v335_v61  ;;  %v339_v4 = vld [vmem:[#allocation2 + $0x798] sm:$0xff] }
 0x134   :  { %1903 = vmatpush1.bf16.msra.mxu0 %v4879_v5  ;;  %1985 = vmatpush1.bf16.msra.mxu1 %v4881_v6  ;;  %v343_v5 = vld [vmem:[#allocation2 + $0x7b8] sm:$0xff]  ;;  %v4943_v6 = vcombine.low %v330_v58, %v334_v59  ;;  %v5491_v58 = vld [vmem:[#allocation4 + $0x120] ss:$16 sps:$4 sm:$0xff]  }
 0x135   :  { %1904 = vmatprep.subr.bf16.mxu0 %v4888_v7  ;;  %1986 = vmatprep.subr.bf16.mxu1 %v4890_v10  ;;  %v4945_v7 = vcombine.low %v331_v60, %v335_v61  ;;  %v4954_v9 = vcombine.high %v339_v4, %v343_v5  ;;  %v346_v10 = vld [vmem:[#allocation2 + $0x7d0] sm:$0xff]  ;;  %v5494_v59 = vld [vmem:[#allocation4 + $0x128] ss:$16 sps:$4 sm:$0xff]   ;;  %v5502_v61 = vld [vmem:[#allocation4 + $0x14c] ss:$16 sps:$4 sm:$0xff]  }
 0x136   :  { %v4960_v18 = vcombine.high %v346_v10, %v350_v11  ;;  %v5499_v60 = vld [vmem:[#allocation4 + $0x144] ss:$16 sps:$4 sm:$0xff]  }
 0x138   :  { %1905 = vmatpush1.bf16.msra.mxu0 %v4887_v14  ;;  %1987 = vmatpush1.bf16.msra.mxu1 %v4889_v16  ;;  %v351_v14 = vld [vmem:[#allocation2 + $0x7f8] sm:$0xff]  ;;  %v4951_v16 = vcombine.low %v338_v2, %v342_v3  ;;  %v5503_v2 = vld [vmem:[#allocation4 + $0x160] ss:$16 sps:$4 sm:$0xff]  }
 0x139   :  { %1906 = vmatprep.subr.bf16.mxu0 %v4896_v17  ;;  %1988 = vmatprep.subr.bf16.mxu1 %v4898_v20  ;;  %v4953_v17 = vcombine.low %v339_v4, %v343_v5  ;;  %v4962_v19 = vcombine.high %v347_v13, %v351_v14  ;;  %v4959_v20 = vcombine.low %v346_v10, %v350_v11  ;;  %v5506_v3 = vld [vmem:[#allocation4 + $0x168] ss:$16 sps:$4 sm:$0xff]   ;;  %v5511_v4 = vld [vmem:[#allocation4 + $0x184] ss:$16 sps:$4 sm:$0xff]   ;;  %v5514_v5 = vld [vmem:[#allocation4 + $0x18c] ss:$16 sps:$4 sm:$0xff]  }
 0x13a   :  { %v4961_v21 = vcombine.low %v347_v13, %v351_v14  ;;  %v5515_v10 = vld [vmem:[#allocation4 + $0x1a0] ss:$16 sps:$4 sm:$0xff]   ;;  %v5518_v11 = vld [vmem:[#allocation4 + $0x1a8] ss:$16 sps:$4 sm:$0xff]   ;;  %v5523_v13 = vld [vmem:[#allocation4 + $0x1c4] ss:$16 sps:$4 sm:$0xff]  }
 0x13b   :  { %v5526_v14 = vld [vmem:[#allocation4 + $0x1cc] ss:$16 sps:$4 sm:$0xff]  }
 0x13c   :  { %1907 = vmatpush1.bf16.msra.mxu0 %v4895_v53  ;;  %1989 = vmatpush1.bf16.msra.mxu1 %v4897_v25  ;;  %v5442_v53 = vld [vmem:[#allocation4 + $0xc] ss:$16 sps:$4 sm:$0xff]   ;;  %v5437_v25 = vld [vmem:[#allocation4] ss:$16 sps:$4 sm:$0xff]  }
 0x13d   :  { %1908 = vmatprep.subr.bf16.mxu0 %v4904_v26  ;;  %1990 = vmatprep.subr.bf16.mxu1 %v4906_v29  ;;  %v5440_v26 = vld [vmem:[#allocation4 + $0x8] ss:$16 sps:$4 sm:$0xff]   ;;  %v5443_v29 = vld [vmem:[#allocation4 + $0x20] ss:$16 sps:$4 sm:$0xff]  }
 0x140   :  { %1909 = vmatpush1.bf16.msra.mxu0 %v4903_v32  ;;  %1991 = vmatpush1.bf16.msra.mxu1 %v4905_v33  ;;  %v5454_v32 = vld [vmem:[#allocation4 + $0x4c] ss:$16 sps:$4 sm:$0xff]   ;;  %v5449_v33 = vld [vmem:[#allocation4 + $0x40] ss:$16 sps:$4 sm:$0xff]  }
 0x141   :  { %1910 = vmatprep.subr.bf16.mxu0 %v4912_v15  ;;  %1992 = vmatprep.subr.bf16.mxu1 %v4914_v37  ;;  %v5452_v15 = vld [vmem:[#allocation4 + $0x48] ss:$16 sps:$4 sm:$0xff]   ;;  %v5463_v37 = vld [vmem:[#allocation4 + $0x84] ss:$16 sps:$4 sm:$0xff]  }
 0x144   :  { %1911 = vmatpush1.bf16.msra.mxu0 %v4911_v39  ;;  %1993 = vmatpush1.bf16.msra.mxu1 %v4913_v42  ;;  %v5461_v39 = vld [vmem:[#allocation4 + $0x80] ss:$16 sps:$4 sm:$0xff]   ;;  %v5472_v42 = vld [vmem:[#allocation4 + $0xac] ss:$16 sps:$4 sm:$0xff]  }
 0x145   :  { %1912 = vmatprep.subr.bf16.mxu0 %v4920_v43  ;;  %1994 = vmatprep.subr.bf16.mxu1 %v4922_v46  ;;  %v5467_v43 = vld [vmem:[#allocation4 + $0xa0] ss:$16 sps:$4 sm:$0xff]   ;;  %v5478_v46 = vld [vmem:[#allocation4 + $0xcc] ss:$16 sps:$4 sm:$0xff]  }
 0x148   :  { %1913 = vmatpush1.bf16.msra.mxu0 %v4919_v47  ;;  %1995 = vmatpush1.bf16.msra.mxu1 %v4921_v49  ;;  %v5473_v47 = vld [vmem:[#allocation4 + $0xc0] ss:$16 sps:$4 sm:$0xff]   ;;  %v5484_v49 = vld [vmem:[#allocation4 + $0xec] ss:$16 sps:$4 sm:$0xff]  }
 0x149   :  { %1914 = vmatprep.subr.bf16.mxu0 %v4928_v50  ;;  %1996 = vmatprep.subr.bf16.mxu1 %v4930_v52  ;;  %v5479_v50 = vld [vmem:[#allocation4 + $0xe0] ss:$16 sps:$4 sm:$0xff]   ;;  %v5490_v52 = vld [vmem:[#allocation4 + $0x10c] ss:$16 sps:$4 sm:$0xff]  }
 0x14c   :  { %1915 = vmatpush1.bf16.msra.mxu0 %v4927_v54  ;;  %1997 = vmatpush1.bf16.msra.mxu1 %v4929_v55  ;;  %v5485_v54 = vld [vmem:[#allocation4 + $0x100] ss:$16 sps:$4 sm:$0xff]   ;;  %v5488_v55 = vld [vmem:[#allocation4 + $0x108] ss:$16 sps:$4 sm:$0xff]  }
 0x14d   :  { %1916 = vmatprep.subr.bf16.mxu0 %v4936_v56  ;;  %1998 = vmatprep.subr.bf16.mxu1 %v4938_v23  ;;  %v5493_v56 = vld [vmem:[#allocation4 + $0x124] ss:$16 sps:$4 sm:$0xff]   ;;  %v5496_v23 = vld [vmem:[#allocation4 + $0x12c] ss:$16 sps:$4 sm:$0xff]  }
 0x150   :  { %1917 = vmatpush1.bf16.msra.mxu0 %v4935_v62  ;;  %1999 = vmatpush1.bf16.msra.mxu1 %v4937_v63  ;;  %v5497_v62 = vld [vmem:[#allocation4 + $0x140] ss:$16 sps:$4 sm:$0xff]   ;;  %v5500_v63 = vld [vmem:[#allocation4 + $0x148] ss:$16 sps:$4 sm:$0xff]  }
 0x151   :  { %1918 = vmatprep.subr.bf16.mxu0 %v4944_v0  ;;  %2000 = vmatprep.subr.bf16.mxu1 %v4946_v1  ;;  %v5505_v0 = vld [vmem:[#allocation4 + $0x164] ss:$16 sps:$4 sm:$0xff]   ;;  %v5508_v1 = vld [vmem:[#allocation4 + $0x16c] ss:$16 sps:$4 sm:$0xff]  }
 0x154   :  { %1919 = vmatpush1.bf16.msra.mxu0 %v4943_v6  ;;  %2001 = vmatpush1.bf16.msra.mxu1 %v4945_v7  ;;  %v5509_v6 = vld [vmem:[#allocation4 + $0x180] ss:$16 sps:$4 sm:$0xff]   ;;  %v5512_v7 = vld [vmem:[#allocation4 + $0x188] ss:$16 sps:$4 sm:$0xff]  }
 0x155   :  { %1920 = vmatprep.subr.bf16.mxu0 %v4952_v8  ;;  %2002 = vmatprep.subr.bf16.mxu1 %v4954_v9  ;;  %v5517_v8 = vld [vmem:[#allocation4 + $0x1a4] ss:$16 sps:$4 sm:$0xff]   ;;  %v5520_v9 = vld [vmem:[#allocation4 + $0x1ac] ss:$16 sps:$4 sm:$0xff]  }
 0x158   :  { %1921 = vmatpush1.bf16.msra.mxu0 %v4951_v16  ;;  %2003 = vmatpush1.bf16.msra.mxu1 %v4953_v17  ;;  %v5521_v16 = vld [vmem:[#allocation4 + $0x1c0] ss:$16 sps:$4 sm:$0xff]   ;;  %v5524_v17 = vld [vmem:[#allocation4 + $0x1c8] ss:$16 sps:$4 sm:$0xff]  }
 0x159   :  { %1922 = vmatprep.subr.bf16.mxu0 %v4960_v18  ;;  %2004 = vmatprep.subr.bf16.mxu1 %v4962_v19  ;;  %v5529_v18 = vld [vmem:[#allocation4 + $0x1e4] ss:$16 sps:$4 sm:$0xff]   ;;  %v5532_v19 = vld [vmem:[#allocation4 + $0x1ec] ss:$16 sps:$4 sm:$0xff]  }
 0x15c   :  { %1923 = vmatpush1.bf16.msra.mxu0 %v4959_v20  ;;  %2005 = vmatpush1.bf16.msra.mxu1 %v4961_v21  ;;  %v5527_v20 = vld [vmem:[#allocation4 + $0x1e0] ss:$16 sps:$4 sm:$0xff]   ;;  %v5530_v21 = vld [vmem:[#allocation4 + $0x1e8] ss:$16 sps:$4 sm:$0xff]  }
 0x15d   :  { %3589 = vmatprep.subr.bf16.mxu0 %v5439_v22  ;;  %3753 = vmatprep.subr.bf16.mxu1 %v5442_v53  ;;  %v5535_v22 = vld [vmem:[#allocation4 + $0x204] ss:$16 sps:$4 sm:$0xff]   ;;  %v5538_v53 = vld [vmem:[#allocation4 + $0x20c] ss:$16 sps:$4 sm:$0xff]  }
 0x15f   :  { %1925 = vmatmul.mubr.bf16.vlgmr.msra.gmra.mrb[4].mxu0 %v6202_v24  ;;  %2007 = vmatmul.mubr.bf16.vlgmr.msra.gmra.mrb[4].mxu1 %v6202_v24  ;;  %v5458_v24 = vld [vmem:[#allocation4 + $0x68] ss:$16 sps:$4 sm:$0xff]  }
 0x160   :  { %3590 = vmatpush1.bf16.msra.mxu0 %v5437_v25  ;;  %3754 = vmatpush1.bf16.msra.mxu1 %v5440_v26  ;;  %v353_v25 = vlaneseq }
 0x161   :  { %3591 = vmatprep.subr.bf16.mxu0 %v5445_v27  ;;  %3755 = vmatprep.subr.bf16.mxu1 %v5448_v28  ;;  %v6219_v28 = vld [vmem:[#allocation9] sm:$0xff] }
 0x162   :  { %v6214_v26 = vshrl.u32 %v353_v25, 7  ;;  %v5595_v25 = vld [vmem:[#allocation4 + $0x344] ss:$16 sps:$4 sm:$0xff]  }
 0x164   :  { %3592 = vmatpush1.bf16.msra.mxu0 %v5443_v29  ;;  %3756 = vmatpush1.bf16.msra.mxu1 %v5446_v30  ;;  %v6217_v27 = vsub.s32 0, %v6214_v26  ;;  %v6222_v29 = vsub.s32 1, %v6214_v26  ;;  %v367_v30 = vsub.s32 3, %v6214_v26 }
 0x165   :  { %3593 = vmatprep.subr.bf16.mxu0 %v5451_v31  ;;  %3757 = vmatprep.subr.bf16.mxu1 %v5454_v32 }
 0x166   :  { %v356_v31 = vrot.slane %v6219_v28, %v6217_v27  ;;  %v360_v32 = vrot.slane %v6219_v28, %v6222_v29 }
 0x168   :  { %3594 = vmatpush1.bf16.msra.mxu0 %v5449_v33  ;;  %3758 = vmatpush1.bf16.msra.mxu1 %v5452_v15  ;;  %v368_v33 = vrot.slane %v6219_v28, %v367_v30 }
 0x169   :  { %3595 = vmatprep.subr.bf16.mxu0 %v5457_v34  ;;  %3759 = vmatprep.subr.bf16.mxu1 %v5460_v35 }
 0x16c   :  { %3596 = vmatpush1.bf16.msra.mxu0 %v5455_v36  ;;  %3760 = vmatpush1.bf16.msra.mxu1 %v5458_v24 }
 0x16d   :  { %3597 = vmatprep.subr.bf16.mxu0 %v5463_v37  ;;  %3761 = vmatprep.subr.bf16.mxu1 %v5466_v38 }
 0x170   :  { %3598 = vmatpush1.bf16.msra.mxu0 %v5461_v39  ;;  %3762 = vmatpush1.bf16.msra.mxu1 %v5464_v40 }
 0x171   :  { %3599 = vmatprep.subr.bf16.mxu0 %v5469_v41  ;;  %3763 = vmatprep.subr.bf16.mxu1 %v5472_v42 }
 0x174   :  { %3600 = vmatpush1.bf16.msra.mxu0 %v5467_v43  ;;  %3764 = vmatpush1.bf16.msra.mxu1 %v5470_v44 }
 0x175   :  { %3601 = vmatprep.subr.bf16.mxu0 %v5475_v45  ;;  %3765 = vmatprep.subr.bf16.mxu1 %v5478_v46 }
 0x178   :  { %3602 = vmatpush1.bf16.msra.mxu0 %v5473_v47  ;;  %3766 = vmatpush1.bf16.msra.mxu1 %v5476_v48  ;;  %v5533_v47 = vld [vmem:[#allocation4 + $0x200] ss:$16 sps:$4 sm:$0xff]   ;;  %v5536_v48 = vld [vmem:[#allocation4 + $0x208] ss:$16 sps:$4 sm:$0xff]  }
 0x179   :  { %3603 = vmatprep.subr.bf16.mxu0 %v5481_v12  ;;  %3767 = vmatprep.subr.bf16.mxu1 %v5484_v49  ;;  %v5541_v49 = vld [vmem:[#allocation4 + $0x224] ss:$16 sps:$4 sm:$0xff]  }
 0x17c   :  { %3604 = vmatpush1.bf16.msra.mxu0 %v5479_v50  ;;  %3768 = vmatpush1.bf16.msra.mxu1 %v5482_v51  ;;  %v5544_v50 = vld [vmem:[#allocation4 + $0x22c] ss:$16 sps:$4 sm:$0xff]  }
 0x17d   :  { %3605 = vmatprep.subr.bf16.mxu0 %v5487_v57  ;;  %3769 = vmatprep.subr.bf16.mxu1 %v5490_v52  ;;  %v5539_v57 = vld [vmem:[#allocation4 + $0x220] ss:$16 sps:$4 sm:$0xff]   ;;  %v5542_v52 = vld [vmem:[#allocation4 + $0x228] ss:$16 sps:$4 sm:$0xff]  }
 0x180   :  { %3606 = vmatpush1.bf16.msra.mxu0 %v5485_v54  ;;  %3770 = vmatpush1.bf16.msra.mxu1 %v5488_v55  ;;  %v5547_v54 = vld [vmem:[#allocation4 + $0x244] ss:$16 sps:$4 sm:$0xff]   ;;  %v5550_v55 = vld [vmem:[#allocation4 + $0x24c] ss:$16 sps:$4 sm:$0xff]  }
 0x181   :  { %3607 = vmatprep.subr.bf16.mxu0 %v5493_v56  ;;  %3771 = vmatprep.subr.bf16.mxu1 %v5496_v23  ;;  %v5545_v56 = vld [vmem:[#allocation4 + $0x240] ss:$16 sps:$4 sm:$0xff]   ;;  %v5548_v23 = vld [vmem:[#allocation4 + $0x248] ss:$16 sps:$4 sm:$0xff]  }
 0x184   :  { %3608 = vmatpush1.bf16.msra.mxu0 %v5491_v58  ;;  %3772 = vmatpush1.bf16.msra.mxu1 %v5494_v59  ;;  %v5553_v58 = vld [vmem:[#allocation4 + $0x264] ss:$16 sps:$4 sm:$0xff]   ;;  %v5556_v59 = vld [vmem:[#allocation4 + $0x26c] ss:$16 sps:$4 sm:$0xff]  }
 0x185   :  { %3609 = vmatprep.subr.bf16.mxu0 %v5499_v60  ;;  %3773 = vmatprep.subr.bf16.mxu1 %v5502_v61  ;;  %v5551_v60 = vld [vmem:[#allocation4 + $0x260] ss:$16 sps:$4 sm:$0xff]   ;;  %v5554_v61 = vld [vmem:[#allocation4 + $0x268] ss:$16 sps:$4 sm:$0xff]  }
 0x188   :  { %3610 = vmatpush1.bf16.msra.mxu0 %v5497_v62  ;;  %3774 = vmatpush1.bf16.msra.mxu1 %v5500_v63  ;;  %v5559_v62 = vld [vmem:[#allocation4 + $0x284] ss:$16 sps:$4 sm:$0xff]   ;;  %v5562_v63 = vld [vmem:[#allocation4 + $0x28c] ss:$16 sps:$4 sm:$0xff]  }
 0x189   :  { %3611 = vmatprep.subr.bf16.mxu0 %v5505_v0  ;;  %3775 = vmatprep.subr.bf16.mxu1 %v5508_v1  ;;  %v5557_v0 = vld [vmem:[#allocation4 + $0x280] ss:$16 sps:$4 sm:$0xff]   ;;  %v5560_v1 = vld [vmem:[#allocation4 + $0x288] ss:$16 sps:$4 sm:$0xff]  }
 0x18c   :  { %3612 = vmatpush1.bf16.msra.mxu0 %v5503_v2  ;;  %3776 = vmatpush1.bf16.msra.mxu1 %v5506_v3  ;;  %v5565_v2 = vld [vmem:[#allocation4 + $0x2a4] ss:$16 sps:$4 sm:$0xff]   ;;  %v5568_v3 = vld [vmem:[#allocation4 + $0x2ac] ss:$16 sps:$4 sm:$0xff]  }
 0x18d   :  { %3613 = vmatprep.subr.bf16.mxu0 %v5511_v4  ;;  %3777 = vmatprep.subr.bf16.mxu1 %v5514_v5  ;;  %v5563_v4 = vld [vmem:[#allocation4 + $0x2a0] ss:$16 sps:$4 sm:$0xff]   ;;  %v5566_v5 = vld [vmem:[#allocation4 + $0x2a8] ss:$16 sps:$4 sm:$0xff]  }
 0x190   :  { %3614 = vmatpush1.bf16.msra.mxu0 %v5509_v6  ;;  %3778 = vmatpush1.bf16.msra.mxu1 %v5512_v7  ;;  %v5571_v6 = vld [vmem:[#allocation4 + $0x2c4] ss:$16 sps:$4 sm:$0xff]   ;;  %v5574_v7 = vld [vmem:[#allocation4 + $0x2cc] ss:$16 sps:$4 sm:$0xff]  }
 0x191   :  { %3615 = vmatprep.subr.bf16.mxu0 %v5517_v8  ;;  %3779 = vmatprep.subr.bf16.mxu1 %v5520_v9  ;;  %v5569_v8 = vld [vmem:[#allocation4 + $0x2c0] ss:$16 sps:$4 sm:$0xff]   ;;  %v5572_v9 = vld [vmem:[#allocation4 + $0x2c8] ss:$16 sps:$4 sm:$0xff]  }
 0x194   :  { %3616 = vmatpush1.bf16.msra.mxu0 %v5515_v10  ;;  %3780 = vmatpush1.bf16.msra.mxu1 %v5518_v11  ;;  %v5577_v10 = vld [vmem:[#allocation4 + $0x2e4] ss:$16 sps:$4 sm:$0xff]   ;;  %v5580_v11 = vld [vmem:[#allocation4 + $0x2ec] ss:$16 sps:$4 sm:$0xff]  }
 0x195   :  { %3617 = vmatprep.subr.bf16.mxu0 %v5523_v13  ;;  %3781 = vmatprep.subr.bf16.mxu1 %v5526_v14  ;;  %v5575_v13 = vld [vmem:[#allocation4 + $0x2e0] ss:$16 sps:$4 sm:$0xff]   ;;  %v5578_v14 = vld [vmem:[#allocation4 + $0x2e8] ss:$16 sps:$4 sm:$0xff]  }
 0x198   :  { %3618 = vmatpush1.bf16.msra.mxu0 %v5521_v16  ;;  %3782 = vmatpush1.bf16.msra.mxu1 %v5524_v17  ;;  %v5583_v16 = vld [vmem:[#allocation4 + $0x304] ss:$16 sps:$4 sm:$0xff]   ;;  %v5586_v17 = vld [vmem:[#allocation4 + $0x30c] ss:$16 sps:$4 sm:$0xff]  }
 0x199   :  { %3619 = vmatprep.subr.bf16.mxu0 %v5529_v18  ;;  %3783 = vmatprep.subr.bf16.mxu1 %v5532_v19  ;;  %v5581_v18 = vld [vmem:[#allocation4 + $0x300] ss:$16 sps:$4 sm:$0xff]   ;;  %v5584_v19 = vld [vmem:[#allocation4 + $0x308] ss:$16 sps:$4 sm:$0xff]  }
 0x19c   :  { %3620 = vmatpush1.bf16.msra.mxu0 %v5527_v20  ;;  %3784 = vmatpush1.bf16.msra.mxu1 %v5530_v21  ;;  %v5589_v20 = vld [vmem:[#allocation4 + $0x324] ss:$16 sps:$4 sm:$0xff]   ;;  %v5592_v21 = vld [vmem:[#allocation4 + $0x32c] ss:$16 sps:$4 sm:$0xff]  }
 0x19d   :  { %3630 = vmatprep.subr.bf16.mxu0 %v5535_v22  ;;  %3794 = vmatprep.subr.bf16.mxu1 %v5538_v53  ;;  %v5587_v22 = vld [vmem:[#allocation4 + $0x320] ss:$16 sps:$4 sm:$0xff]   ;;  %v5590_v53 = vld [vmem:[#allocation4 + $0x328] ss:$16 sps:$4 sm:$0xff]  }
 0x1b2   :  { %v1762_v15 = vpop.f32.mrb[0].mxu0  ;;  %v6232_v35 = vpop.f32.mrb[0].mxu1 }
 0x1b3   :  { %v5360_v34 = vadd.f32 %v1762_v15, %v356_v31  ;;  %v1764_v36 = vpop.f32.mrb[1].mxu0  ;;  %v1846_v37 = vpop.f32.mrb[1].mxu1  ;;  %v5598_v31 = vld [vmem:[#allocation4 + $0x34c] ss:$16 sps:$4 sm:$0xff]   ;;  %v5601_v15 = vld [vmem:[#allocation4 + $0x364] ss:$16 sps:$4 sm:$0xff]  }
 0x1b4   :  { %v5361_v24 = vadd.f32 %v1764_v36, %v360_v32  ;;  %v1766_v38 = vpop.f32.mrb[2].mxu0  ;;  %v5363_v40 = vadd.f32 %v1846_v37, %v368_v33  ;;  %v1848_v41 = vpop.f32.mrb[2].mxu1  ;;  %v5593_v32 = vld [vmem:[#allocation4 + $0x340] ss:$16 sps:$4 sm:$0xff]   ;;  %v5596_v33 = vld [vmem:[#allocation4 + $0x348] ss:$16 sps:$4 sm:$0xff]  }
 0x1b5   :  { %v2015_v39 = vmax.f32 %v5360_v34, 0.0  ;;  %v1767_v42 = vpop.f32.mrb[3].mxu0  ;;  %v1849_v44 = vpop.f32.mrb[3].mxu1  ;;  %v5604_v34 = vld [vmem:[#allocation4 + $0x36c] ss:$16 sps:$4 sm:$0xff]   ;;  %v363_v41 = vsub.s32 2, %v6214_v26 }
 0x1b6   :  { %v2016_v43 = vmax.f32 %v5361_v24, 0.0  ;;  %v2018_v45 = vmax.f32 %v5363_v40, 0.0  ;;  %v5599_v36 = vld [vmem:[#allocation4 + $0x360] ss:$16 sps:$4 sm:$0xff]   ;;  %v5602_v24 = vld [vmem:[#allocation4 + $0x368] ss:$16 sps:$4 sm:$0xff]  }
 0x1b7   :  { %v2024_v12 = vpack.c.bf16 %v2015_v39, %v2015_v39  ;;  %v5607_v37 = vld [vmem:[#allocation4 + $0x384] ss:$16 sps:$4 sm:$0xff]   ;;  %v5610_v38 = vld [vmem:[#allocation4 + $0x38c] ss:$16 sps:$4 sm:$0xff]   ;;  %v5605_v39 = vld [vmem:[#allocation4 + $0x380] ss:$16 sps:$4 sm:$0xff]  }
 0x1b8   :  { %v2025_v46 = vpack.c.bf16 %v2016_v43, %v2016_v43  ;;  %v2027_v51 = vpack.c.bf16 %v2018_v45, %v2018_v45  ;;  %v5608_v40 = vld [vmem:[#allocation4 + $0x388] ss:$16 sps:$4 sm:$0xff]   ;;  %v5613_v42 = vld [vmem:[#allocation4 + $0x3a4] ss:$16 sps:$4 sm:$0xff]   ;;  %v5616_v43 = vld [vmem:[#allocation4 + $0x3ac] ss:$16 sps:$4 sm:$0xff]  }
 0x1b9   :  { %v5611_v44 = vld [vmem:[#allocation4 + $0x3a0] ss:$16 sps:$4 sm:$0xff]   ;;  %v5614_v45 = vld [vmem:[#allocation4 + $0x3a8] ss:$16 sps:$4 sm:$0xff]  }
 0x1ba   :  { %3621 = vmatprep.mubr.bf16.mxu0 %v2025_v46  ;;  %3785 = vmatprep.mubr.bf16.mxu1 %v2025_v46  ;;  %v364_v46 = vrot.slane %v6219_v28, %v363_v41 }
 0x1bb   :  { %3622 = vmatmul.mubr.bf16.vlgmr.msra.gmra.mrb[8].mxu0 %v2024_v12  ;;  %3786 = vmatmul.mubr.bf16.vlgmr.msra.gmra.mrb[8].mxu1 %v2024_v12  ;;  %v5617_v12 = vld [vmem:[#allocation4 + $0x3c0] ss:$16 sps:$4 sm:$0xff]  }
 0x1bc   :  { %3631 = vmatpush1.bf16.msra.mxu0 %v5533_v47  ;;  %3795 = vmatpush1.bf16.msra.mxu1 %v5536_v48  ;;  %v5619_v47 = vld [vmem:[#allocation4 + $0x3c4] ss:$16 sps:$4 sm:$0xff]   ;;  %v5622_v48 = vld [vmem:[#allocation4 + $0x3cc] ss:$16 sps:$4 sm:$0xff]  }
 0x1bd   :  { %3662 = vmatprep.mubr.bf16.mxu0 %v2027_v51  ;;  %3826 = vmatprep.mubr.bf16.mxu1 %v2027_v51  ;;  %v5625_v51 = vld [vmem:[#allocation4 + $0x3e4] ss:$16 sps:$4 sm:$0xff]  }
 0x1be   :  { %3632 = vmatprep.subr.bf16.mxu0 %v5541_v49  ;;  %3796 = vmatprep.subr.bf16.mxu1 %v5544_v50  ;;  %v5620_v49 = vld [vmem:[#allocation4 + $0x3c8] ss:$16 sps:$4 sm:$0xff]   ;;  %v5362_v50 = vadd.f32 %v6232_v35, %v364_v46  ;;  %v5637_v35 = vld [vmem:[#allocation4 + $0x424] ss:$16 sps:$4 sm:$0xff]   ;;  %v5695_v46 = vld [vmem:[#allocation4 + $0x560] ss:$16 sps:$4 sm:$0xff]  }
 0x1c0   :  { %3633 = vmatpush1.bf16.msra.mxu0 %v5539_v57  ;;  %3797 = vmatpush1.bf16.msra.mxu1 %v5542_v52  ;;  %v5628_v57 = vld [vmem:[#allocation4 + $0x3ec] ss:$16 sps:$4 sm:$0xff]   ;;  %v5623_v52 = vld [vmem:[#allocation4 + $0x3e0] ss:$16 sps:$4 sm:$0xff]  }
 0x1c1   :  { %3634 = vmatprep.subr.bf16.mxu0 %v5547_v54  ;;  %3798 = vmatprep.subr.bf16.mxu1 %v5550_v55  ;;  %v5626_v54 = vld [vmem:[#allocation4 + $0x3e8] ss:$16 sps:$4 sm:$0xff]   ;;  %v2017_v55 = vmax.f32 %v5362_v50, 0.0 }
 0x1c2   :  { %v5704_v50 = vld [vmem:[#allocation4 + $0x588] ss:$16 sps:$4 sm:$0xff]  }
 0x1c4   :  { %3635 = vmatpush1.bf16.msra.mxu0 %v5545_v56  ;;  %3799 = vmatpush1.bf16.msra.mxu1 %v5548_v23  ;;  %v5631_v56 = vld [vmem:[#allocation4 + $0x404] ss:$16 sps:$4 sm:$0xff]   ;;  %v5634_v23 = vld [vmem:[#allocation4 + $0x40c] ss:$16 sps:$4 sm:$0xff]  }
 0x1c5   :  { %3636 = vmatprep.subr.bf16.mxu0 %v5553_v58  ;;  %3800 = vmatprep.subr.bf16.mxu1 %v5556_v59  ;;  %v5629_v58 = vld [vmem:[#allocation4 + $0x400] ss:$16 sps:$4 sm:$0xff]   ;;  %v5632_v59 = vld [vmem:[#allocation4 + $0x408] ss:$16 sps:$4 sm:$0xff]  }
 0x1c8   :  { %3637 = vmatpush1.bf16.msra.mxu0 %v5551_v60  ;;  %3801 = vmatpush1.bf16.msra.mxu1 %v5554_v61  ;;  %v2026_v60 = vpack.c.bf16 %v2017_v55, %v2017_v55  ;;  %v5640_v61 = vld [vmem:[#allocation4 + $0x42c] ss:$16 sps:$4 sm:$0xff]   ;;  %v5710_v55 = vld [vmem:[#allocation4 + $0x5a8] ss:$16 sps:$4 sm:$0xff]  }
 0x1c9   :  { %3638 = vmatprep.subr.bf16.mxu0 %v5559_v62  ;;  %3802 = vmatprep.subr.bf16.mxu1 %v5562_v63  ;;  %v5635_v62 = vld [vmem:[#allocation4 + $0x420] ss:$16 sps:$4 sm:$0xff]   ;;  %v5638_v63 = vld [vmem:[#allocation4 + $0x428] ss:$16 sps:$4 sm:$0xff]  }
 0x1cc   :  { %3639 = vmatpush1.bf16.msra.mxu0 %v5557_v0  ;;  %3803 = vmatpush1.bf16.msra.mxu1 %v5560_v1  ;;  %v5643_v0 = vld [vmem:[#allocation4 + $0x444] ss:$16 sps:$4 sm:$0xff]   ;;  %v5646_v1 = vld [vmem:[#allocation4 + $0x44c] ss:$16 sps:$4 sm:$0xff]  }
 0x1cd   :  { %3640 = vmatprep.subr.bf16.mxu0 %v5565_v2  ;;  %3804 = vmatprep.subr.bf16.mxu1 %v5568_v3  ;;  %v5641_v2 = vld [vmem:[#allocation4 + $0x440] ss:$16 sps:$4 sm:$0xff]   ;;  %v5644_v3 = vld [vmem:[#allocation4 + $0x448] ss:$16 sps:$4 sm:$0xff]  }
 0x1d0   :  { %3641 = vmatpush1.bf16.msra.mxu0 %v5563_v4  ;;  %3805 = vmatpush1.bf16.msra.mxu1 %v5566_v5  ;;  %v5649_v4 = vld [vmem:[#allocation4 + $0x464] ss:$16 sps:$4 sm:$0xff]   ;;  %v5652_v5 = vld [vmem:[#allocation4 + $0x46c] ss:$16 sps:$4 sm:$0xff]  }
 0x1d1   :  { %3642 = vmatprep.subr.bf16.mxu0 %v5571_v6  ;;  %3806 = vmatprep.subr.bf16.mxu1 %v5574_v7  ;;  %v5647_v6 = vld [vmem:[#allocation4 + $0x460] ss:$16 sps:$4 sm:$0xff]   ;;  %v5650_v7 = vld [vmem:[#allocation4 + $0x468] ss:$16 sps:$4 sm:$0xff]  }
 0x1d4   :  { %3643 = vmatpush1.bf16.msra.mxu0 %v5569_v8  ;;  %3807 = vmatpush1.bf16.msra.mxu1 %v5572_v9  ;;  %v5655_v8 = vld [vmem:[#allocation4 + $0x484] ss:$16 sps:$4 sm:$0xff]   ;;  %v5658_v9 = vld [vmem:[#allocation4 + $0x48c] ss:$16 sps:$4 sm:$0xff]  }
 0x1d5   :  { %3644 = vmatprep.subr.bf16.mxu0 %v5577_v10  ;;  %3808 = vmatprep.subr.bf16.mxu1 %v5580_v11  ;;  %v5653_v10 = vld [vmem:[#allocation4 + $0x480] ss:$16 sps:$4 sm:$0xff]   ;;  %v5656_v11 = vld [vmem:[#allocation4 + $0x488] ss:$16 sps:$4 sm:$0xff]  }
 0x1d8   :  { %3645 = vmatpush1.bf16.msra.mxu0 %v5575_v13  ;;  %3809 = vmatpush1.bf16.msra.mxu1 %v5578_v14  ;;  %v5661_v13 = vld [vmem:[#allocation4 + $0x4a4] ss:$16 sps:$4 sm:$0xff]   ;;  %v5664_v14 = vld [vmem:[#allocation4 + $0x4ac] ss:$16 sps:$4 sm:$0xff]  }
 0x1d9   :  { %3646 = vmatprep.subr.bf16.mxu0 %v5583_v16  ;;  %3810 = vmatprep.subr.bf16.mxu1 %v5586_v17  ;;  %v5659_v16 = vld [vmem:[#allocation4 + $0x4a0] ss:$16 sps:$4 sm:$0xff]   ;;  %v5662_v17 = vld [vmem:[#allocation4 + $0x4a8] ss:$16 sps:$4 sm:$0xff]  }
 0x1dc   :  { %3647 = vmatpush1.bf16.msra.mxu0 %v5581_v18  ;;  %3811 = vmatpush1.bf16.msra.mxu1 %v5584_v19  ;;  %v5667_v18 = vld [vmem:[#allocation4 + $0x4c4] ss:$16 sps:$4 sm:$0xff]   ;;  %v5670_v19 = vld [vmem:[#allocation4 + $0x4cc] ss:$16 sps:$4 sm:$0xff]  }
 0x1dd   :  { %3648 = vmatprep.subr.bf16.mxu0 %v5589_v20  ;;  %3812 = vmatprep.subr.bf16.mxu1 %v5592_v21  ;;  %v5665_v20 = vld [vmem:[#allocation4 + $0x4c0] ss:$16 sps:$4 sm:$0xff]   ;;  %v5668_v21 = vld [vmem:[#allocation4 + $0x4c8] ss:$16 sps:$4 sm:$0xff]  }
 0x1e0   :  { %3649 = vmatpush1.bf16.msra.mxu0 %v5587_v22  ;;  %3813 = vmatpush1.bf16.msra.mxu1 %v5590_v53  ;;  %v5673_v22 = vld [vmem:[#allocation4 + $0x4e4] ss:$16 sps:$4 sm:$0xff]   ;;  %v5676_v53 = vld [vmem:[#allocation4 + $0x4ec] ss:$16 sps:$4 sm:$0xff]  }
 0x1e1   :  { %3650 = vmatprep.subr.bf16.mxu0 %v5595_v25  ;;  %3814 = vmatprep.subr.bf16.mxu1 %v5598_v31  ;;  %v5671_v25 = vld [vmem:[#allocation4 + $0x4e0] ss:$16 sps:$4 sm:$0xff]   ;;  %v5674_v31 = vld [vmem:[#allocation4 + $0x4e8] ss:$16 sps:$4 sm:$0xff]  }
 0x1e4   :  { %3651 = vmatpush1.bf16.msra.mxu0 %v5593_v32  ;;  %3815 = vmatpush1.bf16.msra.mxu1 %v5596_v33  ;;  %v5679_v32 = vld [vmem:[#allocation4 + $0x504] ss:$16 sps:$4 sm:$0xff]   ;;  %v5682_v33 = vld [vmem:[#allocation4 + $0x50c] ss:$16 sps:$4 sm:$0xff]  }
 0x1e5   :  { %3652 = vmatprep.subr.bf16.mxu0 %v5601_v15  ;;  %3816 = vmatprep.subr.bf16.mxu1 %v5604_v34  ;;  %v5677_v15 = vld [vmem:[#allocation4 + $0x500] ss:$16 sps:$4 sm:$0xff]   ;;  %v5680_v34 = vld [vmem:[#allocation4 + $0x508] ss:$16 sps:$4 sm:$0xff]  }
 0x1e8   :  { %3653 = vmatpush1.bf16.msra.mxu0 %v5599_v36  ;;  %3817 = vmatpush1.bf16.msra.mxu1 %v5602_v24  ;;  %v5685_v36 = vld [vmem:[#allocation4 + $0x524] ss:$16 sps:$4 sm:$0xff]   ;;  %v5688_v24 = vld [vmem:[#allocation4 + $0x52c] ss:$16 sps:$4 sm:$0xff]  }
 0x1e9   :  { %3654 = vmatprep.subr.bf16.mxu0 %v5607_v37  ;;  %3818 = vmatprep.subr.bf16.mxu1 %v5610_v38  ;;  %v5683_v37 = vld [vmem:[#allocation4 + $0x520] ss:$16 sps:$4 sm:$0xff]   ;;  %v5686_v38 = vld [vmem:[#allocation4 + $0x528] ss:$16 sps:$4 sm:$0xff]  }
 0x1ec   :  { %3655 = vmatpush1.bf16.msra.mxu0 %v5605_v39  ;;  %3819 = vmatpush1.bf16.msra.mxu1 %v5608_v40  ;;  %v5691_v39 = vld [vmem:[#allocation4 + $0x544] ss:$16 sps:$4 sm:$0xff]   ;;  %v5694_v40 = vld [vmem:[#allocation4 + $0x54c] ss:$16 sps:$4 sm:$0xff]  }
 0x1ed   :  { %3656 = vmatprep.subr.bf16.mxu0 %v5613_v42  ;;  %3820 = vmatprep.subr.bf16.mxu1 %v5616_v43  ;;  %v5689_v42 = vld [vmem:[#allocation4 + $0x540] ss:$16 sps:$4 sm:$0xff]   ;;  %v5692_v43 = vld [vmem:[#allocation4 + $0x548] ss:$16 sps:$4 sm:$0xff]  }
 0x1f0   :  { %3657 = vmatpush1.bf16.msra.mxu0 %v5611_v44  ;;  %3821 = vmatpush1.bf16.msra.mxu1 %v5614_v45  ;;  %v5697_v44 = vld [vmem:[#allocation4 + $0x564] ss:$16 sps:$4 sm:$0xff]   ;;  %v5700_v45 = vld [vmem:[#allocation4 + $0x56c] ss:$16 sps:$4 sm:$0xff]  }
 0x1f1   :  { %3658 = vmatprep.subr.bf16.mxu0 %v5619_v47  ;;  %3822 = vmatprep.subr.bf16.mxu1 %v5622_v48  ;;  %v5698_v47 = vld [vmem:[#allocation4 + $0x568] ss:$16 sps:$4 sm:$0xff]   ;;  %v5703_v48 = vld [vmem:[#allocation4 + $0x584] ss:$16 sps:$4 sm:$0xff]  }
 0x1f4   :  { %3659 = vmatpush1.bf16.msra.mxu0 %v5617_v12  ;;  %3823 = vmatpush1.bf16.msra.mxu1 %v5620_v49  ;;  %v5706_v12 = vld [vmem:[#allocation4 + $0x58c] ss:$16 sps:$4 sm:$0xff]   ;;  %v5701_v49 = vld [vmem:[#allocation4 + $0x580] ss:$16 sps:$4 sm:$0xff]  }
 0x1f5   :  { %3660 = vmatprep.subr.bf16.mxu0 %v5625_v51  ;;  %3824 = vmatprep.subr.bf16.mxu1 %v5628_v57  ;;  %v5709_v51 = vld [vmem:[#allocation4 + $0x5a4] ss:$16 sps:$4 sm:$0xff]   ;;  %v5712_v57 = vld [vmem:[#allocation4 + $0x5ac] ss:$16 sps:$4 sm:$0xff]  }
 0x1f8   :  { %3661 = vmatpush1.bf16.msra.mxu0 %v5623_v52  ;;  %3825 = vmatpush1.bf16.msra.mxu1 %v5626_v54  ;;  %v371_v52 = vsub.s32 4, %v6214_v26  ;;  %v5707_v54 = vld [vmem:[#allocation4 + $0x5a0] ss:$16 sps:$4 sm:$0xff]  }
 0x1f9   :  { %3671 = vmatprep.subr.bf16.mxu0 %v5631_v56  ;;  %3835 = vmatprep.subr.bf16.mxu1 %v5634_v23  ;;  %v375_v56 = vsub.s32 5, %v6214_v26  ;;  %v5715_v23 = vld [vmem:[#allocation4 + $0x5c4] ss:$16 sps:$4 sm:$0xff]  }
 0x1fb   :  { %3663 = vmatmul.mubr.bf16.vlgmr.msra.gmra.mrb[8].mxu0 %v2026_v60  ;;  %3827 = vmatmul.mubr.bf16.vlgmr.msra.gmra.mrb[8].mxu1 %v2026_v60  ;;  %v372_v60 = vrot.slane %v6219_v28, %v371_v52  ;;  %v5766_v52 = vld [vmem:[#allocation4 + $0x6cc] ss:$16 sps:$4 sm:$0xff]  }
 0x1fc   :  { %3672 = vmatpush1.bf16.msra.mxu0 %v5629_v58  ;;  %3836 = vmatpush1.bf16.msra.mxu1 %v5632_v59  ;;  %v5718_v58 = vld [vmem:[#allocation4 + $0x5cc] ss:$16 sps:$4 sm:$0xff]   ;;  %v383_v59 = vsub.s32 7, %v6214_v26 }
 0x1fd   :  { %3673 = vmatprep.subr.bf16.mxu0 %v5637_v35  ;;  %3837 = vmatprep.subr.bf16.mxu1 %v5640_v61  ;;  %v5713_v35 = vld [vmem:[#allocation4 + $0x5c0] ss:$16 sps:$4 sm:$0xff]   ;;  %v5716_v61 = vld [vmem:[#allocation4 + $0x5c8] ss:$16 sps:$4 sm:$0xff]  }
 0x200   :  { %3674 = vmatpush1.bf16.msra.mxu0 %v5635_v62  ;;  %3838 = vmatpush1.bf16.msra.mxu1 %v5638_v63  ;;  %v376_v62 = vrot.slane %v6219_v28, %v375_v56  ;;  %v384_v63 = vrot.slane %v6219_v28, %v383_v59  ;;  %v5769_v56 = vld [vmem:[#allocation4 + $0x6e4] ss:$16 sps:$4 sm:$0xff]   ;;  %v5770_v59 = vld [vmem:[#allocation4 + $0x6e8] ss:$16 sps:$4 sm:$0xff]  }
 0x201   :  { %3675 = vmatprep.subr.bf16.mxu0 %v5643_v0  ;;  %3839 = vmatprep.subr.bf16.mxu1 %v5646_v1  ;;  %v5721_v0 = vld [vmem:[#allocation4 + $0x5e4] ss:$16 sps:$4 sm:$0xff]   ;;  %v5724_v1 = vld [vmem:[#allocation4 + $0x5ec] ss:$16 sps:$4 sm:$0xff]  }
 0x204   :  { %3676 = vmatpush1.bf16.msra.mxu0 %v5641_v2  ;;  %3840 = vmatpush1.bf16.msra.mxu1 %v5644_v3 }
 0x205   :  { %3677 = vmatprep.subr.bf16.mxu0 %v5649_v4  ;;  %3841 = vmatprep.subr.bf16.mxu1 %v5652_v5 }
 0x208   :  { %3678 = vmatpush1.bf16.msra.mxu0 %v5647_v6  ;;  %3842 = vmatpush1.bf16.msra.mxu1 %v5650_v7  ;;  %v5719_v6 = vld [vmem:[#allocation4 + $0x5e0] ss:$16 sps:$4 sm:$0xff]  }
 0x209   :  { %3679 = vmatprep.subr.bf16.mxu0 %v5655_v8  ;;  %3843 = vmatprep.subr.bf16.mxu1 %v5658_v9 }
 0x20c   :  { %3680 = vmatpush1.bf16.msra.mxu0 %v5653_v10  ;;  %3844 = vmatpush1.bf16.msra.mxu1 %v5656_v11  ;;  %v5722_v10 = vld [vmem:[#allocation4 + $0x5e8] ss:$16 sps:$4 sm:$0xff]   ;;  %v5727_v11 = vld [vmem:[#allocation4 + $0x604] ss:$16 sps:$4 sm:$0xff]  }
 0x20d   :  { %3681 = vmatprep.subr.bf16.mxu0 %v5661_v13  ;;  %3845 = vmatprep.subr.bf16.mxu1 %v5664_v14 }
 0x210   :  { %3682 = vmatpush1.bf16.msra.mxu0 %v5659_v16  ;;  %3846 = vmatpush1.bf16.msra.mxu1 %v5662_v17 }
 0x211   :  { %3683 = vmatprep.subr.bf16.mxu0 %v5667_v18  ;;  %3847 = vmatprep.subr.bf16.mxu1 %v5670_v19  ;;  %v5730_v18 = vld [vmem:[#allocation4 + $0x60c] ss:$16 sps:$4 sm:$0xff]  }
 0x214   :  { %3684 = vmatpush1.bf16.msra.mxu0 %v5665_v20  ;;  %3848 = vmatpush1.bf16.msra.mxu1 %v5668_v21 }
 0x215   :  { %3685 = vmatprep.subr.bf16.mxu0 %v5673_v22  ;;  %3849 = vmatprep.subr.bf16.mxu1 %v5676_v53  ;;  %v5725_v53 = vld [vmem:[#allocation4 + $0x600] ss:$16 sps:$4 sm:$0xff]  }
 0x218   :  { %3686 = vmatpush1.bf16.msra.mxu0 %v5671_v25  ;;  %3850 = vmatpush1.bf16.msra.mxu1 %v5674_v31  ;;  %v5728_v25 = vld [vmem:[#allocation4 + $0x608] ss:$16 sps:$4 sm:$0xff]  }
 0x219   :  { %3687 = vmatprep.subr.bf16.mxu0 %v5679_v32  ;;  %3851 = vmatprep.subr.bf16.mxu1 %v5682_v33  ;;  %v5733_v32 = vld [vmem:[#allocation4 + $0x624] ss:$16 sps:$4 sm:$0xff]   ;;  %v5736_v33 = vld [vmem:[#allocation4 + $0x62c] ss:$16 sps:$4 sm:$0xff]  }
 0x21c   :  { %3688 = vmatpush1.bf16.msra.mxu0 %v5677_v15  ;;  %3852 = vmatpush1.bf16.msra.mxu1 %v5680_v34  ;;  %v5731_v34 = vld [vmem:[#allocation4 + $0x620] ss:$16 sps:$4 sm:$0xff]  }
 0x21d   :  { %3689 = vmatprep.subr.bf16.mxu0 %v5685_v36  ;;  %3853 = vmatprep.subr.bf16.mxu1 %v5688_v24  ;;  %v5734_v36 = vld [vmem:[#allocation4 + $0x628] ss:$16 sps:$4 sm:$0xff]   ;;  %v5739_v24 = vld [vmem:[#allocation4 + $0x644] ss:$16 sps:$4 sm:$0xff]  }
 0x220   :  { %3690 = vmatpush1.bf16.msra.mxu0 %v5683_v37  ;;  %3854 = vmatpush1.bf16.msra.mxu1 %v5686_v38  ;;  %v5742_v37 = vld [vmem:[#allocation4 + $0x64c] ss:$16 sps:$4 sm:$0xff]   ;;  %v5737_v38 = vld [vmem:[#allocation4 + $0x640] ss:$16 sps:$4 sm:$0xff]  }
 0x221   :  { %3691 = vmatprep.subr.bf16.mxu0 %v5691_v39  ;;  %3855 = vmatprep.subr.bf16.mxu1 %v5694_v40  ;;  %v5740_v39 = vld [vmem:[#allocation4 + $0x648] ss:$16 sps:$4 sm:$0xff]   ;;  %v5745_v40 = vld [vmem:[#allocation4 + $0x664] ss:$16 sps:$4 sm:$0xff]  }
 0x224   :  { %3692 = vmatpush1.bf16.msra.mxu0 %v5689_v42  ;;  %3856 = vmatpush1.bf16.msra.mxu1 %v5692_v43  ;;  %v5748_v42 = vld [vmem:[#allocation4 + $0x66c] ss:$16 sps:$4 sm:$0xff]   ;;  %v5743_v43 = vld [vmem:[#allocation4 + $0x660] ss:$16 sps:$4 sm:$0xff]  }
 0x225   :  { %3693 = vmatprep.subr.bf16.mxu0 %v5697_v44  ;;  %3857 = vmatprep.subr.bf16.mxu1 %v5700_v45  ;;  %v5746_v44 = vld [vmem:[#allocation4 + $0x668] ss:$16 sps:$4 sm:$0xff]   ;;  %v5751_v45 = vld [vmem:[#allocation4 + $0x684] ss:$16 sps:$4 sm:$0xff]  }
 0x228   :  { %3694 = vmatpush1.bf16.msra.mxu0 %v5695_v46  ;;  %3858 = vmatpush1.bf16.msra.mxu1 %v5698_v47  ;;  %v5754_v46 = vld [vmem:[#allocation4 + $0x68c] ss:$16 sps:$4 sm:$0xff]   ;;  %v5749_v47 = vld [vmem:[#allocation4 + $0x680] ss:$16 sps:$4 sm:$0xff]  }
 0x229   :  { %3695 = vmatprep.subr.bf16.mxu0 %v5703_v48  ;;  %3859 = vmatprep.subr.bf16.mxu1 %v5706_v12  ;;  %v5752_v48 = vld [vmem:[#allocation4 + $0x688] ss:$16 sps:$4 sm:$0xff]   ;;  %v5757_v12 = vld [vmem:[#allocation4 + $0x6a4] ss:$16 sps:$4 sm:$0xff]  }
 0x22c   :  { %3696 = vmatpush1.bf16.msra.mxu0 %v5701_v49  ;;  %3860 = vmatpush1.bf16.msra.mxu1 %v5704_v50  ;;  %v5760_v49 = vld [vmem:[#allocation4 + $0x6ac] ss:$16 sps:$4 sm:$0xff]   ;;  %v5755_v50 = vld [vmem:[#allocation4 + $0x6a0] ss:$16 sps:$4 sm:$0xff]  }
 0x22d   :  { %3697 = vmatprep.subr.bf16.mxu0 %v5709_v51  ;;  %3861 = vmatprep.subr.bf16.mxu1 %v5712_v57  ;;  %v5758_v51 = vld [vmem:[#allocation4 + $0x6a8] ss:$16 sps:$4 sm:$0xff]   ;;  %v5763_v57 = vld [vmem:[#allocation4 + $0x6c4] ss:$16 sps:$4 sm:$0xff]  }
 0x230   :  { %3698 = vmatpush1.bf16.msra.mxu0 %v5707_v54  ;;  %3862 = vmatpush1.bf16.msra.mxu1 %v5710_v55  ;;  %v5761_v54 = vld [vmem:[#allocation4 + $0x6c0] ss:$16 sps:$4 sm:$0xff]   ;;  %v5764_v55 = vld [vmem:[#allocation4 + $0x6c8] ss:$16 sps:$4 sm:$0xff]  }
 0x231   :  { %3699 = vmatprep.subr.bf16.mxu0 %v5715_v23  ;;  %3863 = vmatprep.subr.bf16.mxu1 %v5718_v58  ;;  %v5772_v23 = vld [vmem:[#allocation4 + $0x6ec] ss:$16 sps:$4 sm:$0xff]   ;;  %v5767_v58 = vld [vmem:[#allocation4 + $0x6e0] ss:$16 sps:$4 sm:$0xff]  }
 0x232   :  { %v1926_v2 = vpop.f32.mrb[4].mxu0  ;;  %v6245_v4 = vpop.f32.mrb[4].mxu1 }
 0x233   :  { %v5364_v3 = vadd.f32 %v1926_v2, %v372_v60  ;;  %v1928_v5 = vpop.f32.mrb[5].mxu0  ;;  %v2010_v8 = vpop.f32.mrb[5].mxu1  ;;  %v5775_v60 = vld [vmem:[#allocation4 + $0x704] ss:$16 sps:$4 sm:$0xff]   ;;  %v5782_v2 = vld [vmem:[#allocation4 + $0x728] ss:$16 sps:$4 sm:$0xff]  }
 0x234   :  { %v5365_v7 = vadd.f32 %v1928_v5, %v376_v62  ;;  %3700 = vmatpush1.bf16.msra.mxu0 %v5713_v35  ;;  %3864 = vmatpush1.bf16.msra.mxu1 %v5716_v61  ;;  %v1930_v9 = vpop.f32.mrb[6].mxu0  ;;  %v5367_v14 = vadd.f32 %v2010_v8, %v384_v63  ;;  %v2012_v16 = vpop.f32.mrb[6].mxu1  ;;  %v5778_v35 = vld [vmem:[#allocation4 + $0x70c] ss:$16 sps:$4 sm:$0xff]   ;;  %v5773_v61 = vld [vmem:[#allocation4 + $0x700] ss:$16 sps:$4 sm:$0xff]  }
 0x235   :  { %v2019_v13 = vmax.f32 %v5364_v3, 0.0  ;;  %v1931_v17 = vpop.f32.mrb[7].mxu0  ;;  %3701 = vmatprep.subr.bf16.mxu0 %v5721_v0  ;;  %3865 = vmatprep.subr.bf16.mxu1 %v5724_v1  ;;  %v2013_v20 = vpop.f32.mrb[7].mxu1  ;;  %v5776_v62 = vld [vmem:[#allocation4 + $0x708] ss:$16 sps:$4 sm:$0xff]  }
 0x236   :  { %v2020_v19 = vmax.f32 %v5365_v7, 0.0  ;;  %v2022_v21 = vmax.f32 %v5367_v14, 0.0  ;;  %v5781_v63 = vld [vmem:[#allocation4 + $0x724] ss:$16 sps:$4 sm:$0xff]   ;;  %v5784_v0 = vld [vmem:[#allocation4 + $0x72c] ss:$16 sps:$4 sm:$0xff]  }
 0x237   :  { %v2028_v31 = vpack.c.bf16 %v2019_v13, %v2019_v13  ;;  %v5779_v1 = vld [vmem:[#allocation4 + $0x720] ss:$16 sps:$4 sm:$0xff]   ;;  %v5787_v3 = vld [vmem:[#allocation4 + $0x744] ss:$16 sps:$4 sm:$0xff]   ;;  %v5790_v5 = vld [vmem:[#allocation4 + $0x74c] ss:$16 sps:$4 sm:$0xff]  }
 0x238   :  { %v2029_v22 = vpack.c.bf16 %v2020_v19, %v2020_v19  ;;  %3702 = vmatpush1.bf16.msra.mxu0 %v5719_v6  ;;  %3866 = vmatpush1.bf16.msra.mxu1 %v5722_v10  ;;  %v2031_v15 = vpack.c.bf16 %v2022_v21, %v2022_v21  ;;  %v5785_v6 = vld [vmem:[#allocation4 + $0x740] ss:$16 sps:$4 sm:$0xff]   ;;  %v5788_v7 = vld [vmem:[#allocation4 + $0x748] ss:$16 sps:$4 sm:$0xff]   ;;  %v5793_v8 = vld [vmem:[#allocation4 + $0x764] ss:$16 sps:$4 sm:$0xff]  }
 0x239   :  { %3712 = vmatprep.subr.bf16.mxu0 %v5727_v11  ;;  %3876 = vmatprep.subr.bf16.mxu1 %v5730_v18  ;;  %v5796_v9 = vld [vmem:[#allocation4 + $0x76c] ss:$16 sps:$4 sm:$0xff]   ;;  %v5791_v10 = vld [vmem:[#allocation4 + $0x760] ss:$16 sps:$4 sm:$0xff]   ;;  %v5794_v11 = vld [vmem:[#allocation4 + $0x768] ss:$16 sps:$4 sm:$0xff]  }
 0x23a   :  { %3703 = vmatprep.mubr.bf16.mxu0 %v2029_v22  ;;  %3867 = vmatprep.mubr.bf16.mxu1 %v2029_v22  ;;  %v5799_v13 = vld [vmem:[#allocation4 + $0x784] ss:$16 sps:$4 sm:$0xff]   ;;  %v5802_v14 = vld [vmem:[#allocation4 + $0x78c] ss:$16 sps:$4 sm:$0xff]   ;;  %v5797_v16 = vld [vmem:[#allocation4 + $0x780] ss:$16 sps:$4 sm:$0xff]  }
 0x23b   :  { %3704 = vmatmul.mubr.bf16.vlgmr.msra.gmra.mrb[8].mxu0 %v2028_v31  ;;  %3868 = vmatmul.mubr.bf16.vlgmr.msra.gmra.mrb[8].mxu1 %v2028_v31  ;;  %v5800_v17 = vld [vmem:[#allocation4 + $0x788] ss:$16 sps:$4 sm:$0xff]   ;;  %v379_v18 = vsub.s32 6, %v6214_v26  ;;  %v5805_v19 = vld [vmem:[#allocation4 + $0x7a4] ss:$16 sps:$4 sm:$0xff]  }
 0x23c   :  { %3713 = vmatpush1.bf16.msra.mxu0 %v5725_v53  ;;  %3877 = vmatpush1.bf16.msra.mxu1 %v5728_v25  ;;  %v5808_v20 = vld [vmem:[#allocation4 + $0x7ac] ss:$16 sps:$4 sm:$0xff]   ;;  %v5803_v21 = vld [vmem:[#allocation4 + $0x7a0] ss:$16 sps:$4 sm:$0xff]   ;;  %v5806_v22 = vld [vmem:[#allocation4 + $0x7a8] ss:$16 sps:$4 sm:$0xff]  }
 0x23d   :  { %3744 = vmatprep.mubr.bf16.mxu0 %v2031_v15  ;;  %3908 = vmatprep.mubr.bf16.mxu1 %v2031_v15  ;;  %v380_v53 = vrot.slane %v6219_v28, %v379_v18  ;;  %v5811_v25 = vld [vmem:[#allocation4 + $0x7c4] ss:$16 sps:$4 sm:$0xff]   ;;  %v5814_v31 = vld [vmem:[#allocation4 + $0x7cc] ss:$16 sps:$4 sm:$0xff]  }
 0x23e   :  { %3714 = vmatprep.subr.bf16.mxu0 %v5733_v32  ;;  %3878 = vmatprep.subr.bf16.mxu1 %v5736_v33  ;;  %v5809_v32 = vld [vmem:[#allocation4 + $0x7c0] ss:$16 sps:$4 sm:$0xff]   ;;  %v5812_v33 = vld [vmem:[#allocation4 + $0x7c8] ss:$16 sps:$4 sm:$0xff]   ;;  %v5823_v28 = vld [vmem:[#allocation6 + $0x4] ss:$8 sps:$4 sm:$0xff]  }
 0x23f   :  { %v5366_v15 = vadd.f32 %v6245_v4, %v380_v53  ;;  %v5824_v4 = vld [vmem:[#allocation6 + $0x10] ss:$8 sps:$4 sm:$0xff]   ;;  %v5926_v18 = vld [vmem:[%s6322_s4 + $0x20] sm:$0xff]  }
 0x240   :  { %3715 = vmatpush1.bf16.msra.mxu0 %v5731_v34  ;;  %3879 = vmatpush1.bf16.msra.mxu1 %v5734_v36  ;;  %v5817_v34 = vld [vmem:[#allocation4 + $0x7e4] ss:$16 sps:$4 sm:$0xff]   ;;  %v5820_v36 = vld [vmem:[#allocation4 + $0x7ec] ss:$16 sps:$4 sm:$0xff]  }
 0x241   :  { %3716 = vmatprep.subr.bf16.mxu0 %v5739_v24  ;;  %3880 = vmatprep.subr.bf16.mxu1 %v5742_v37  ;;  %v5815_v24 = vld [vmem:[#allocation4 + $0x7e0] ss:$16 sps:$4 sm:$0xff]   ;;  %v5818_v37 = vld [vmem:[#allocation4 + $0x7e8] ss:$16 sps:$4 sm:$0xff]  }
 0x242   :  { %v5929_v26 = vld [vmem:[%s6322_s4 + $0x70] sm:$0xff]  }
 0x244   :  { %3717 = vmatpush1.bf16.msra.mxu0 %v5737_v38  ;;  %3881 = vmatpush1.bf16.msra.mxu1 %v5740_v39  ;;  %v2021_v38 = vmax.f32 %v5366_v15, 0.0  ;;  %v5821_v39 = vld [vmem:[#allocation6] ss:$8 sps:$4 sm:$0xff]  }
 0x245   :  { %3718 = vmatprep.subr.bf16.mxu0 %v5745_v40  ;;  %3882 = vmatprep.subr.bf16.mxu1 %v5748_v42  ;;  %v5826_v42 = vld [vmem:[#allocation6 + $0x14] ss:$8 sps:$4 sm:$0xff]  }
 0x246   :  { %v2030_v40 = vpack.c.bf16 %v2021_v38, %v2021_v38 }
 0x248   :  { %3719 = vmatpush1.bf16.msra.mxu0 %v5743_v43  ;;  %3883 = vmatpush1.bf16.msra.mxu1 %v5746_v44  ;;  %v5829_v43 = vld [vmem:[#allocation6 + $0x24] ss:$8 sps:$4 sm:$0xff]   ;;  %v5827_v44 = vld [vmem:[#allocation6 + $0x20] ss:$8 sps:$4 sm:$0xff]  }
 0x249   :  { %3720 = vmatprep.subr.bf16.mxu0 %v5751_v45  ;;  %3884 = vmatprep.subr.bf16.mxu1 %v5754_v46  ;;  %v5832_v45 = vld [vmem:[#allocation6 + $0x34] ss:$8 sps:$4 sm:$0xff]   ;;  %v5830_v46 = vld [vmem:[#allocation6 + $0x30] ss:$8 sps:$4 sm:$0xff]  }
 0x24c   :  { %3721 = vmatpush1.bf16.msra.mxu0 %v5749_v47  ;;  %3885 = vmatpush1.bf16.msra.mxu1 %v5752_v48  ;;  %v5835_v47 = vld [vmem:[#allocation6 + $0x44] ss:$8 sps:$4 sm:$0xff]   ;;  %v5833_v48 = vld [vmem:[#allocation6 + $0x40] ss:$8 sps:$4 sm:$0xff]  }
 0x24d   :  { %3722 = vmatprep.subr.bf16.mxu0 %v5757_v12  ;;  %3886 = vmatprep.subr.bf16.mxu1 %v5760_v49  ;;  %v5838_v12 = vld [vmem:[#allocation6 + $0x54] ss:$8 sps:$4 sm:$0xff]   ;;  %v5836_v49 = vld [vmem:[#allocation6 + $0x50] ss:$8 sps:$4 sm:$0xff]  }
 0x250   :  { %3723 = vmatpush1.bf16.msra.mxu0 %v5755_v50  ;;  %3887 = vmatpush1.bf16.msra.mxu1 %v5758_v51  ;;  %v5841_v50 = vld [vmem:[#allocation6 + $0x64] ss:$8 sps:$4 sm:$0xff]   ;;  %v5839_v51 = vld [vmem:[#allocation6 + $0x60] ss:$8 sps:$4 sm:$0xff]  }
 0x251   :  { %3724 = vmatprep.subr.bf16.mxu0 %v5763_v57  ;;  %3888 = vmatprep.subr.bf16.mxu1 %v5766_v52  ;;  %v5844_v57 = vld [vmem:[#allocation6 + $0x74] ss:$8 sps:$4 sm:$0xff]   ;;  %v5842_v52 = vld [vmem:[#allocation6 + $0x70] ss:$8 sps:$4 sm:$0xff]  }
 0x254   :  { %3725 = vmatpush1.bf16.msra.mxu0 %v5761_v54  ;;  %3889 = vmatpush1.bf16.msra.mxu1 %v5764_v55  ;;  %v5847_v54 = vld [vmem:[#allocation6 + $0x84] ss:$8 sps:$4 sm:$0xff]   ;;  %v5845_v55 = vld [vmem:[#allocation6 + $0x80] ss:$8 sps:$4 sm:$0xff]  }
 0x255   :  { %3726 = vmatprep.subr.bf16.mxu0 %v5769_v56  ;;  %3890 = vmatprep.subr.bf16.mxu1 %v5772_v23  ;;  %v5850_v56 = vld [vmem:[#allocation6 + $0x94] ss:$8 sps:$4 sm:$0xff]   ;;  %v5848_v23 = vld [vmem:[#allocation6 + $0x90] ss:$8 sps:$4 sm:$0xff]  }
 0x258   :  { %3727 = vmatpush1.bf16.msra.mxu0 %v5767_v58  ;;  %3891 = vmatpush1.bf16.msra.mxu1 %v5770_v59  ;;  %v5853_v58 = vld [vmem:[#allocation6 + $0xa4] ss:$8 sps:$4 sm:$0xff]   ;;  %v5851_v59 = vld [vmem:[#allocation6 + $0xa0] ss:$8 sps:$4 sm:$0xff]  }
 0x259   :  { %3728 = vmatprep.subr.bf16.mxu0 %v5775_v60  ;;  %3892 = vmatprep.subr.bf16.mxu1 %v5778_v35  ;;  %v5856_v60 = vld [vmem:[#allocation6 + $0xb4] ss:$8 sps:$4 sm:$0xff]   ;;  %v5854_v35 = vld [vmem:[#allocation6 + $0xb0] ss:$8 sps:$4 sm:$0xff]  }
 0x25c   :  { %3729 = vmatpush1.bf16.msra.mxu0 %v5773_v61  ;;  %3893 = vmatpush1.bf16.msra.mxu1 %v5776_v62  ;;  %v5859_v61 = vld [vmem:[#allocation6 + $0xc4] ss:$8 sps:$4 sm:$0xff]   ;;  %v5857_v62 = vld [vmem:[#allocation6 + $0xc0] ss:$8 sps:$4 sm:$0xff]  }
 0x25d   :  { %3730 = vmatprep.subr.bf16.mxu0 %v5781_v63  ;;  %3894 = vmatprep.subr.bf16.mxu1 %v5784_v0  ;;  %v5862_v63 = vld [vmem:[#allocation6 + $0xd4] ss:$8 sps:$4 sm:$0xff]   ;;  %v5860_v0 = vld [vmem:[#allocation6 + $0xd0] ss:$8 sps:$4 sm:$0xff]  }
 0x260   :  { %3731 = vmatpush1.bf16.msra.mxu0 %v5779_v1  ;;  %3895 = vmatpush1.bf16.msra.mxu1 %v5782_v2  ;;  %v5865_v1 = vld [vmem:[#allocation6 + $0xe4] ss:$8 sps:$4 sm:$0xff]   ;;  %v5863_v2 = vld [vmem:[#allocation6 + $0xe0] ss:$8 sps:$4 sm:$0xff]  }
 0x261   :  { %3732 = vmatprep.subr.bf16.mxu0 %v5787_v3  ;;  %3896 = vmatprep.subr.bf16.mxu1 %v5790_v5  ;;  %v5868_v3 = vld [vmem:[#allocation6 + $0xf4] ss:$8 sps:$4 sm:$0xff]   ;;  %v5866_v5 = vld [vmem:[#allocation6 + $0xf0] ss:$8 sps:$4 sm:$0xff]  }
 0x264   :  { %3733 = vmatpush1.bf16.msra.mxu0 %v5785_v6  ;;  %3897 = vmatpush1.bf16.msra.mxu1 %v5788_v7  ;;  %v5871_v6 = vld [vmem:[#allocation6 + $0x104] ss:$8 sps:$4 sm:$0xff]  }
 0x265   :  { %3734 = vmatprep.subr.bf16.mxu0 %v5793_v8  ;;  %3898 = vmatprep.subr.bf16.mxu1 %v5796_v9  ;;  %v5917_v7 = vld [vmem:[%s6322_s4 + $0x40] sm:$0xff]   ;;  %v5919_v9 = vld [vmem:[%s6322_s4 + $0x48] sm:$0xff]  }
 0x266   :  { %v5918_v8 = vld [vmem:[%s6322_s4] sm:$0xff]  }
 0x268   :  { %3735 = vmatpush1.bf16.msra.mxu0 %v5791_v10  ;;  %3899 = vmatpush1.bf16.msra.mxu1 %v5794_v11  ;;  %v5920_v10 = vld [vmem:[%s6322_s4 + $0x8] sm:$0xff]   ;;  %v5921_v11 = vld [vmem:[%s6322_s4 + $0x50] sm:$0xff]  }
 0x269   :  { %3736 = vmatprep.subr.bf16.mxu0 %v5799_v13  ;;  %3900 = vmatprep.subr.bf16.mxu1 %v5802_v14  ;;  %v5922_v13 = vld [vmem:[%s6322_s4 + $0x10] sm:$0xff]   ;;  %v5923_v14 = vld [vmem:[%s6322_s4 + $0x58] sm:$0xff]  }
 0x26c   :  { %3737 = vmatpush1.bf16.msra.mxu0 %v5797_v16  ;;  %3901 = vmatpush1.bf16.msra.mxu1 %v5800_v17  ;;  %v5924_v16 = vld [vmem:[%s6322_s4 + $0x18] sm:$0xff]   ;;  %v5925_v17 = vld [vmem:[%s6322_s4 + $0x60] sm:$0xff]  }
 0x26d   :  { %3738 = vmatprep.subr.bf16.mxu0 %v5805_v19  ;;  %3902 = vmatprep.subr.bf16.mxu1 %v5808_v20  ;;  %v5927_v19 = vld [vmem:[%s6322_s4 + $0x68] sm:$0xff]  }
 0x26e   :  { %v5928_v20 = vld [vmem:[%s6322_s4 + $0x28] sm:$0xff]  }
 0x270   :  { %3739 = vmatpush1.bf16.msra.mxu0 %v5803_v21  ;;  %3903 = vmatpush1.bf16.msra.mxu1 %v5806_v22  ;;  %v6286_v21 = vld [vmem:[#allocation9 + $0x8] sm:$0xf] }
 0x271   :  { %3740 = vmatprep.subr.bf16.mxu0 %v5811_v25  ;;  %3904 = vmatprep.subr.bf16.mxu1 %v5814_v31  ;;  %v2292_v22 = vrot.slane %v6286_v21, %v6217_v27  ;;  %v2296_v53 = vrot.slane %v6286_v21, %v6222_v29  ;;  %v2304_v25 = vrot.slane %v6286_v21, %v367_v30 }
 0x274   :  { %3741 = vmatpush1.bf16.msra.mxu0 %v5809_v32  ;;  %3905 = vmatpush1.bf16.msra.mxu1 %v5812_v33 }
 0x275   :  { %3742 = vmatprep.subr.bf16.mxu0 %v5817_v34  ;;  %3906 = vmatprep.subr.bf16.mxu1 %v5820_v36 }
 0x278   :  { %3743 = vmatpush1.bf16.msra.mxu0 %v5815_v24  ;;  %3907 = vmatpush1.bf16.msra.mxu1 %v5818_v37 }
 0x279   :  { %4321 = vmatprep.subr.bf16.mxu0 %v5823_v28  ;;  %5309 = vmatprep.subr.bf16.mxu1 %v5917_v7  ;;  %v2300_v7 = vrot.slane %v6286_v21, %v363_v41  ;;  %v5930_v41 = vld [vmem:[%s6322_s4 + $0x30] sm:$0xff]  }
 0x27b   :  { %3745 = vmatmul.mubr.bf16.vlgmr.msra.gmra.mrb[8].mxu0 %v2030_v40  ;;  %3909 = vmatmul.mubr.bf16.vlgmr.msra.gmra.mrb[8].mxu1 %v2030_v40 }
 0x27c   :  { %4322 = vmatpush1.bf16.msra.mxu0 %v5821_v39  ;;  %5310 = vmatpush3.bf16.msra.mxu1 %v5918_v8  ;;  %v5913_v8 = vld [vmem:[#allocation6 + $0x1e4] ss:$8 sps:$4 sm:$0xff]  }
 0x27d   :  { %4323 = vmatprep.subr.bf16.mxu0 %v5826_v42  ;;  %5311 = vmatprep.subr.bf16.mxu1 %v5919_v9  ;;  %v5911_v9 = vld [vmem:[#allocation6 + $0x1e0] ss:$8 sps:$4 sm:$0xff]  }
 0x280   :  { %4324 = vmatpush1.bf16.msra.mxu0 %v5824_v4  ;;  %5312 = vmatpush3.bf16.msra.mxu1 %v5920_v10 }
 0x281   :  { %4325 = vmatprep.subr.bf16.mxu0 %v5829_v43  ;;  %5313 = vmatprep.subr.bf16.mxu1 %v5921_v11  ;;  %v5916_v11 = vld [vmem:[#allocation6 + $0x1f4] ss:$8 sps:$4 sm:$0xff]  }
 0x284   :  { %4326 = vmatpush1.bf16.msra.mxu0 %v5827_v44  ;;  %5314 = vmatpush3.bf16.msra.mxu1 %v5922_v13  ;;  %v5869_v44 = vld [vmem:[#allocation6 + $0x100] ss:$8 sps:$4 sm:$0xff]   ;;  %v5914_v13 = vld [vmem:[#allocation6 + $0x1f0] ss:$8 sps:$4 sm:$0xff]  }
 0x285   :  { %4327 = vmatprep.subr.bf16.mxu0 %v5832_v45  ;;  %5315 = vmatprep.subr.bf16.mxu1 %v5923_v14 }
 0x288   :  { %4328 = vmatpush1.bf16.msra.mxu0 %v5830_v46  ;;  %5316 = vmatpush3.bf16.msra.mxu1 %v5924_v16  ;;  %v5874_v46 = vld [vmem:[#allocation6 + $0x114] ss:$8 sps:$4 sm:$0xff]  }
 0x289   :  { %4329 = vmatprep.subr.bf16.mxu0 %v5835_v47  ;;  %5317 = vmatprep.subr.bf16.mxu1 %v5925_v17  ;;  %v5872_v47 = vld [vmem:[#allocation6 + $0x110] ss:$8 sps:$4 sm:$0xff]  }
 0x28a   :  { %v5931_v17 = vld [vmem:[%s6322_s4 + $0x78] sm:$0xff]  }
 0x28c   :  { %4330 = vmatpush1.bf16.msra.mxu0 %v5833_v48  ;;  %5318 = vmatpush3.bf16.msra.mxu1 %v5926_v18  ;;  %v5877_v48 = vld [vmem:[#allocation6 + $0x124] ss:$8 sps:$4 sm:$0xff]   ;;  %v5932_v18 = vld [vmem:[%s6322_s4 + $0x38] sm:$0xff]  }
 0x28d   :  { %4331 = vmatprep.subr.bf16.mxu0 %v5838_v12  ;;  %5319 = vmatprep.subr.bf16.mxu1 %v5927_v19  ;;  %v5875_v12 = vld [vmem:[#allocation6 + $0x120] ss:$8 sps:$4 sm:$0xff]   ;;  %v6070_v19 = vmov 0.0  }
 0x290   :  { %4332 = vmatpush1.bf16.msra.mxu0 %v5836_v49  ;;  %5320 = vmatpush3.bf16.msra.mxu1 %v5928_v20  ;;  %v5880_v49 = vld [vmem:[#allocation6 + $0x134] ss:$8 sps:$4 sm:$0xff]   ;;  %v3921_v20 = vld [vmem:[#allocation9 + $0xc] sm:$0x3] }
 0x291   :  { %4333 = vmatprep.subr.bf16.mxu0 %v5841_v50  ;;  %v5878_v50 = vld [vmem:[#allocation6 + $0x130] ss:$8 sps:$4 sm:$0xff]   ;;  %5321 = vmatprep.subr.bf16.mxu1 %v5929_v26  ;;  %v3994_v21 = vrot.slane %v3921_v20, %v6217_v27 }
 0x292   :  { %v5935_v27 = vld [vmem:[#allocation7 + $0x10] sm:$0xff]  }
 0x294   :  { %4334 = vmatpush1.bf16.msra.mxu0 %v5839_v51  ;;  %v5883_v51 = vld [vmem:[#allocation6 + $0x144] ss:$8 sps:$4 sm:$0xff]   ;;  %5322 = vmatpush3.bf16.msra.mxu1 %v5930_v41 }
 0x295   :  { %4335 = vmatprep.subr.bf16.mxu0 %v5844_v57  ;;  %v5881_v57 = vld [vmem:[#allocation6 + $0x140] ss:$8 sps:$4 sm:$0xff]   ;;  %5323 = vmatprep.subr.bf16.mxu1 %v5931_v17 }
 0x298   :  { %4336 = vmatpush1.bf16.msra.mxu0 %v5842_v52  ;;  %v5886_v52 = vld [vmem:[#allocation6 + $0x154] ss:$8 sps:$4 sm:$0xff]   ;;  %5324 = vmatpush3.bf16.msra.mxu1 %v5932_v18 }
 0x299   :  { %4337 = vmatprep.subr.bf16.mxu0 %v5847_v54  ;;  %v5884_v54 = vld [vmem:[#allocation6 + $0x150] ss:$8 sps:$4 sm:$0xff]   ;;  %5340 = vmatprep.subr.bf16.mxu1 %v6070_v19 }
 0x29c   :  { %4338 = vmatpush1.bf16.msra.mxu0 %v5845_v55  ;;  %v5889_v55 = vld [vmem:[#allocation6 + $0x164] ss:$8 sps:$4 sm:$0xff]  }
 0x29d   :  { %4339 = vmatprep.subr.bf16.mxu0 %v5850_v56  ;;  %v5887_v56 = vld [vmem:[#allocation6 + $0x160] ss:$8 sps:$4 sm:$0xff]  }
 0x2a0   :  { %4340 = vmatpush1.bf16.msra.mxu0 %v5848_v23  ;;  %v5892_v23 = vld [vmem:[#allocation6 + $0x174] ss:$8 sps:$4 sm:$0xff]  }
 0x2a1   :  { %4341 = vmatprep.subr.bf16.mxu0 %v5853_v58  ;;  %v5890_v58 = vld [vmem:[#allocation6 + $0x170] ss:$8 sps:$4 sm:$0xff]  }
 0x2a4   :  { %4342 = vmatpush1.bf16.msra.mxu0 %v5851_v59  ;;  %v5895_v59 = vld [vmem:[#allocation6 + $0x184] ss:$8 sps:$4 sm:$0xff]  }
 0x2a5   :  { %4343 = vmatprep.subr.bf16.mxu0 %v5856_v60  ;;  %v5893_v60 = vld [vmem:[#allocation6 + $0x180] ss:$8 sps:$4 sm:$0xff]  }
 0x2a8   :  { %4344 = vmatpush1.bf16.msra.mxu0 %v5854_v35  ;;  %v5898_v35 = vld [vmem:[#allocation6 + $0x194] ss:$8 sps:$4 sm:$0xff]  }
 0x2a9   :  { %4345 = vmatprep.subr.bf16.mxu0 %v5859_v61  ;;  %v5896_v61 = vld [vmem:[#allocation6 + $0x190] ss:$8 sps:$4 sm:$0xff]  }
 0x2ac   :  { %4346 = vmatpush1.bf16.msra.mxu0 %v5857_v62  ;;  %v5901_v62 = vld [vmem:[#allocation6 + $0x1a4] ss:$8 sps:$4 sm:$0xff]  }
 0x2ad   :  { %4347 = vmatprep.subr.bf16.mxu0 %v5862_v63  ;;  %v5899_v63 = vld [vmem:[#allocation6 + $0x1a0] ss:$8 sps:$4 sm:$0xff]  }
 0x2b0   :  { %4348 = vmatpush1.bf16.msra.mxu0 %v5860_v0  ;;  %v5904_v0 = vld [vmem:[#allocation6 + $0x1b4] ss:$8 sps:$4 sm:$0xff]  }
 0x2b1   :  { %4349 = vmatprep.subr.bf16.mxu0 %v5865_v1  ;;  %v5902_v1 = vld [vmem:[#allocation6 + $0x1b0] ss:$8 sps:$4 sm:$0xff]  }
 0x2b4   :  { %4350 = vmatpush1.bf16.msra.mxu0 %v5863_v2  ;;  %v5907_v2 = vld [vmem:[#allocation6 + $0x1c4] ss:$8 sps:$4 sm:$0xff]  }
 0x2b5   :  { %4351 = vmatprep.subr.bf16.mxu0 %v5868_v3  ;;  %v5905_v3 = vld [vmem:[#allocation6 + $0x1c0] ss:$8 sps:$4 sm:$0xff]  }
 0x2b8   :  { %4352 = vmatpush1.bf16.msra.mxu0 %v5866_v5  ;;  %v5910_v5 = vld [vmem:[#allocation6 + $0x1d4] ss:$8 sps:$4 sm:$0xff]  }
 0x2b9   :  { %4362 = vmatprep.subr.bf16.mxu0 %v5871_v6  ;;  %v5908_v6 = vld [vmem:[#allocation6 + $0x1d0] ss:$8 sps:$4 sm:$0xff]  }
 0x34e   :  { %v3746_v31 = vpop.f32.mrb[8].mxu0  ;;  %v6295_v32 = vpop.f32.mrb[8].mxu1 }
 0x34f   :  { %v5368_v33 = vadd.f32 %v3746_v31, %v2292_v22  ;;  %v3748_v15 = vpop.f32.mrb[9].mxu0  ;;  %v3912_v34 = vpop.f32.mrb[9].mxu1  ;;  %v5370_v10 = vadd.f32 %v6295_v32, %v2300_v7  ;;  %v3998_v22 = vrot.slane %v3921_v20, %v6222_v29  ;;  %v5936_v29 = vld [vmem:[#allocation7 + $0x18] sm:$0xff]  }
 0x350   :  { %v5369_v36 = vadd.f32 %v3748_v15, %v2296_v53  ;;  %v5371_v24 = vadd.f32 %v3912_v34, %v2304_v25  ;;  %v3750_v37 = vpop.f32.mrb[10].mxu0  ;;  %v3914_v38 = vpop.f32.mrb[10].mxu1 }
 0x351   :  { %v3917_v28 = vmax.f32 %v5368_v33, 0.0  ;;  %v3751_v39 = vpop.f32.mrb[11].mxu0  ;;  %v3915_v40 = vpop.f32.mrb[11].mxu1  ;;  %v3919_v14 = vmax.f32 %v5370_v10, 0.0  ;;  %v5933_v37 = vld [vmem:[#allocation7] sm:$0xff]  }
 0x352   :  { %v3918_v42 = vmax.f32 %v5369_v36, 0.0  ;;  %v3920_v4 = vmax.f32 %v5371_v24, 0.0  ;;  %v5937_v39 = vld [vmem:[#allocation7 + $0x20] sm:$0xff]   ;;  %v5938_v40 = vld [vmem:[#allocation7 + $0x28] sm:$0xff]  }
 0x353   :  { %v3922_v45 = vpack.c.bf16 %v3917_v28, %v3917_v28  ;;  %v3924_v16 = vpack.c.bf16 %v3919_v14, %v3919_v14  ;;  %v5934_v28 = vld [vmem:[#allocation7 + $0x8] sm:$0xff]  }
 0x354   :  { %v3923_v43 = vpack.c.bf16 %v3918_v42, %v3918_v42  ;;  %v3925_v30 = vpack.c.bf16 %v3920_v4, %v3920_v4  ;;  %v5939_v42 = vld [vmem:[#allocation7 + $0x30] sm:$0xff]   ;;  %v5940_v4 = vld [vmem:[#allocation7 + $0x38] sm:$0xff]  }
 0x356   :  { %4353 = vmatprep.mubr.bf16.mxu0 %v3923_v43 }
 0x357   :  { %4354 = vmatmul.mubr.bf16.vlgmr.msra.gmra.mrb[12].mxu0 %v3922_v45 }
 0x358   :  { %4363 = vmatpush1.bf16.msra.mxu0 %v5869_v44  ;;  %4394 = vmatprep.mubr.bf16.mxu0 %v3925_v30  ;;  %v5283_v44 = vld [vmem:[#allocation9 + $0xe] ss:$0 sm:$0xff] }
 0x359   :  { %4364 = vmatprep.subr.bf16.mxu0 %v5874_v46 }
 0x35c   :  { %4365 = vmatpush1.bf16.msra.mxu0 %v5872_v47 }
 0x35d   :  { %4366 = vmatprep.subr.bf16.mxu0 %v5877_v48 }
 0x360   :  { %4367 = vmatpush1.bf16.msra.mxu0 %v5875_v12 }
 0x361   :  { %4368 = vmatprep.subr.bf16.mxu0 %v5880_v49 }
 0x364   :  { %4369 = vmatpush1.bf16.msra.mxu0 %v5878_v50  ;;  %v5300_v50 = vld [vmem:[#allocation9 + $0xf] ss:$0 sm:$0xff] }
 0x365   :  { %4370 = vmatprep.subr.bf16.mxu0 %v5883_v51 }
 0x368   :  { %4371 = vmatpush1.bf16.msra.mxu0 %v5881_v57 }
 0x369   :  { %4372 = vmatprep.subr.bf16.mxu0 %v5886_v52 }
 0x36c   :  { %4373 = vmatpush1.bf16.msra.mxu0 %v5884_v54 }
 0x36d   :  { %4374 = vmatprep.subr.bf16.mxu0 %v5889_v55 }
 0x370   :  { %4375 = vmatpush1.bf16.msra.mxu0 %v5887_v56 }
 0x371   :  { %4376 = vmatprep.subr.bf16.mxu0 %v5892_v23 }
 0x374   :  { %4377 = vmatpush1.bf16.msra.mxu0 %v5890_v58 }
 0x375   :  { %4378 = vmatprep.subr.bf16.mxu0 %v5895_v59 }
 0x378   :  { %4379 = vmatpush1.bf16.msra.mxu0 %v5893_v60 }
 0x379   :  { %4380 = vmatprep.subr.bf16.mxu0 %v5898_v35 }
 0x37c   :  { %4381 = vmatpush1.bf16.msra.mxu0 %v5896_v61 }
 0x37d   :  { %4382 = vmatprep.subr.bf16.mxu0 %v5901_v62 }
 0x380   :  { %4383 = vmatpush1.bf16.msra.mxu0 %v5899_v63 }
 0x381   :  { %4384 = vmatprep.subr.bf16.mxu0 %v5904_v0 }
 0x384   :  { %4385 = vmatpush1.bf16.msra.mxu0 %v5902_v1 }
 0x385   :  { %4386 = vmatprep.subr.bf16.mxu0 %v5907_v2 }
 0x388   :  { %4387 = vmatpush1.bf16.msra.mxu0 %v5905_v3 }
 0x389   :  { %4388 = vmatprep.subr.bf16.mxu0 %v5910_v5 }
 0x38c   :  { %4389 = vmatpush1.bf16.msra.mxu0 %v5908_v6 }
 0x38d   :  { %4390 = vmatprep.subr.bf16.mxu0 %v5913_v8 }
 0x390   :  { %4391 = vmatpush1.bf16.msra.mxu0 %v5911_v9 }
 0x391   :  { %4392 = vmatprep.subr.bf16.mxu0 %v5916_v11 }
 0x394   :  { %4393 = vmatpush1.bf16.msra.mxu0 %v5914_v13 }
 0x397   :  { %4395 = vmatmul.mubr.bf16.vlgmr.msra.gmra.mrb[12].mxu0 %v3924_v16 }
 0x46a   :  { %v4396_v53 = vpop.f32.mrb[12].mxu0 }
 0x46b   :  { %v5372_v25 = vadd.f32 %v4396_v53, %v3994_v21  ;;  %v4398_v31 = vpop.f32.mrb[13].mxu0 }
 0x46c   :  { %v5373_v32 = vadd.f32 %v4398_v31, %v3998_v22  ;;  %v4400_v33 = vpop.f32.mrb[14].mxu0 }
 0x46d   :  { %v4403_v15 = vmax.f32 %v5372_v25, 0.0  ;;  %v4401_v34 = vpop.f32.mrb[15].mxu0 }
 0x46e   :  { %v4404_v36 = vmax.f32 %v5373_v32, 0.0 }
 0x46f   :  { %v4406_v38 = vpack.c.bf16 %v4403_v15, %v4403_v15 }
 0x470   :  { %v4407_v24 = vpack.c.bf16 %v4404_v36, %v4404_v36 }
 0x472   :  { %4574 = vmatprep.mubr.bf16.mxu1 %v4407_v24 }
 0x473   :  { %4575 = vmatmul.mubr.bf16.vlgmr.msra.gmra.mrb[12].mxu1 %v4406_v38 }
 0x474   :  { %5341 = vmatpush3.bf16.msra.mxu1 %v5933_v37  ;;  %5356 = vmatprep.mubr.msk.bf16.mxu1 %vm6071_vm0, %v6070_v19 }
 0x475   :  { %5342 = vmatprep.subr.bf16.mxu1 %v6070_v19 }
 0x478   :  { %5343 = vmatpush3.bf16.msra.mxu1 %v5934_v28 }
 0x479   :  { %5344 = vmatprep.subr.bf16.mxu1 %v6070_v19 }
 0x47c   :  { %5345 = vmatpush3.bf16.msra.mxu1 %v5935_v27 }
 0x47d   :  { %5346 = vmatprep.subr.bf16.mxu1 %v6070_v19 }
 0x480   :  { %5347 = vmatpush3.bf16.msra.mxu1 %v5936_v29 }
 0x481   :  { %5348 = vmatprep.subr.bf16.mxu1 %v6070_v19 }
 0x484   :  { %5349 = vmatpush3.bf16.msra.mxu1 %v5937_v39 }
 0x485   :  { %5350 = vmatprep.subr.bf16.mxu1 %v6070_v19 }
 0x488   :  { %5351 = vmatpush3.bf16.msra.mxu1 %v5938_v40 }
 0x489   :  { %5352 = vmatprep.subr.bf16.mxu1 %v6070_v19 }
 0x48c   :  { %5353 = vmatpush3.bf16.msra.mxu1 %v5939_v42 }
 0x48d   :  { %5354 = vmatprep.subr.bf16.mxu1 %v6070_v19 }
 0x490   :  { %5355 = vmatpush3.bf16.msra.mxu1 %v5940_v4 }
 0x546   :  { %v5325_v43 = vpop.f32.mrb[12].mxu1 }
 0x547   :  { %v5326_v45 = vpop.f32.mrb[13].mxu1 }
 0x548   :  { %v5327_v46 = vadd.f32 %v5326_v45, %v5325_v43  ;;  %v5328_v30 = vpop.f32.mrb[14].mxu1 }
 0x549   :  { %v5329_v47 = vpop.f32.mrb[15].mxu1 }
 0x54a   :  { %v4577_v48 = vadd.f32 %v5327_v46, %v5283_v44 }
 0x54c   :  { %v4582_v12 = vmax.f32 %v4577_v48, 0.0 }
 0x54e   :  { %v4584_v49 = vpack.c.bf16 %v4582_v12, %v4582_v12 }
 0x550   :  { %5357 = vmatmul.mubr.bf16.vlgmr.msra.gmra.mrb[16].mxu1 %v4584_v49 }
 0x623   :  { %v4689_v51 = vpop.f32.mrb[16].mxu1 }
 0x624   :  { %v4690_v57 = vadd.f32 %v5300_v50, %v4689_v51  ;;  %v5358_v52 = vpop.f32.mrb[17].mxu1 }
 0x625   :  { %v4692_v54 = vpop.f32.mrb[18].mxu1 }
 0x626   :  { %4695 = vst [vmem:[%s6325_s7] sm:$0xff] %v4690_v57  ;;  %v5359_v55 = vpop.f32.mrb[19].mxu1 }
 0x627   :  { %4700 = vsyncpa [#allocation3], 1 }
 0x628   :  { %4701 = vsyncpa [#allocation5], 1 }
 0x629   :  { %4702 = vsyncpa [#allocation8], 1 }

</bundles_post_ra>
